<compile_context>
chip_gen: v7x
topology: tpu7x:2x2x1
jax: 0.10.0
libtpu: 0.0.40
codegen_flags: <defaults>
</compile_context>

<pallas_src>
import functools

import jax
import jax.numpy as jnp
from jax.experimental import pallas as pl
from jax.experimental.pallas import tpu as pltpu

EPS = 1e-5

# Order in which stacked per-layer parameters are passed to the kernel.
PARAM_ORDER = (
    "a1_wq", "a1_bq", "a1_wk", "a1_bk", "a1_wv", "a1_bv", "a1_wp", "a1_bp",
    "a2_wq", "a2_bq", "a2_wk", "a2_bk", "a2_wv", "a2_bv", "a2_wp", "a2_bp",
    "n1b_g", "n1b_b", "n2a_g", "n2a_b", "n2b_g", "n2b_b",
    "m1_w1", "m1_b1", "m1_w2", "m1_b2",
    "m2_w1", "m2_b1", "m2_w2", "m2_b2",
)


def _const_index_map(ndim):
    return lambda g, _n=ndim: (0,) * _n


def _pick_batch_tile(batch, seq, target_m=256):
    """Fold enough batch elements per grid step that the matmul M dim is MXU-sized,
    while keeping >= 2 grid steps (when batch allows) so v7x's two TensorCores both
    get work, and requiring an integral grid."""
    bt = max(1, min(batch, max(1, target_m // max(seq, 1))))
    while bt > 1 and (batch % bt != 0 or batch // bt < 2):
        bt -= 1
    return bt


# --------------------------------- kernel ---------------------------------- #

def _transformer_kernel(*refs, num_layers, d_model, seq_q, seq_kv, batch_tile,
                        scale, use_mask, has_enc):
    refs = list(refs)
    yt_ref = refs.pop()                       # VMEM scratch (Bt*C, S) for the transpose trick
    o_ref = refs.pop()                        # output block (Bt*S, C)
    idx = 0
    x_ref = refs[idx]; idx += 1
    enc_ref = None
    if has_enc:
        enc_ref = refs[idx]; idx += 1
    mask_ref = None
    if use_mask:
        mask_ref = refs[idx]; idx += 1
    (a1_wq, a1_bq, a1_wk, a1_bk, a1_wv, a1_bv, a1_wp, a1_bp,
     a2_wq, a2_bq, a2_wk, a2_bk, a2_wv, a2_bv, a2_wp, a2_bp,
     n1b_g, n1b_b, n2a_g, n2a_b, n2b_g, n2b_b,
     m1_w1, m1_b1, m1_w2, m1_b2,
     m2_w1, m2_b1, m2_w2, m2_b2) = refs[idx:]

    C, S, Se, Bt = d_model, seq_q, seq_kv, batch_tile
    r = C // S                                # scramble factor (C % S == 0 asserted)
    M = Bt * S

    x = x_ref[...]                            # (Bt*S, C) f32 folded activations
    enc = enc_ref[...] if has_enc else None   # (Bt*Se, C) f32
    if use_mask:
        # Hoisted once per kernel invocation (not per layer): mask math is loop-invariant.
        mask = mask_ref[...]                  # (S, S), 1 = future position
        neg_mask = mask * (-1000000.0)

    def layer_norm(h, g, b):
        mu = jnp.mean(h, axis=-1, keepdims=True)
        var = jnp.mean(jnp.square(h - mu), axis=-1, keepdims=True)
        return (h - mu) * jax.lax.rsqrt(var + EPS) * g + b

    def gelu(h):
        # TODO(synk): nn.GELU default is exact erf; tanh approximation (<~1e-3 abs err)
        # keeps the transcendental on the EUP.
        return 0.5 * h * (1.0 + jnp.tanh(0.7978845608028654 * (h + 0.044715 * h * h * h)))

    def softmax_rows(a):
        m = jnp.max(a, axis=-1, keepdims=True)
        p = jnp.exp(a - m)
        return p * pl.reciprocal(jnp.sum(p, axis=-1, keepdims=True), approx=True)

    def proj(h, w_ref, b_ref, l):
        # bf16 operands on the MXU, f32 accumulation, f32 bias add.
        return jnp.dot(h.astype(jnp.bfloat16), w_ref[l],
                       preferred_element_type=jnp.float32) + b_ref[l]

    def attention(l, q_in, kv_in, s_kv, wq, bq, wk, bk, wv, bv, wp, bp, masked):
        # q_in: (Bt*S, C); kv_in: (Bt*s_kv, C).  Projections run on the folded M
        # dimension; only the tiny QK^T / AV products are per-batch-element einsums.
        q = (proj(q_in, wq, bq, l) * scale).astype(jnp.bfloat16).reshape(Bt, S, C)
        k = proj(kv_in, wk, bk, l).astype(jnp.bfloat16).reshape(Bt, s_kv, C)
        v = proj(kv_in, wv, bv, l).astype(jnp.bfloat16).reshape(Bt, s_kv, C)
        attn = jnp.einsum("bqd,bkd->bqk", q, k, preferred_element_type=jnp.float32)
        if masked:
            attn = attn + neg_mask            # additive -1e6 on future positions
        attn = softmax_rows(attn)
        if masked:
            attn = attn * mask                # reproduces the reference's post-softmax bug
        p = attn.astype(jnp.bfloat16)
        # yT[b, c, t] = sum_k v[b, k, c] * attn[b, t, k]  -> (Bt, C, S)
        yT = jnp.einsum("bkd,bqk->bdq", v, p, preferred_element_type=jnp.float32)
        # (attn @ v).transpose(1, 2).reshape(b, S, C) is exactly a strided row gather of
        # yT: scr[b*S+s, a*S+t] = yT[b, s*r+a, t].  Since C = S*r, flattening (Bt, C)
        # makes the source row index (b*S+s)*r + a -> one uniform stride-r slice per `a`.
        yt_ref[...] = yT.reshape(Bt * C, S)
        scr = jnp.concatenate(
            [yt_ref[pl.ds(a, M, stride=r), :] for a in range(r)], axis=1)   # (Bt*S, C)
        return proj(scr, wp, bp, l)

    def layer_body(l, x):
        # Self-attention.  The reference computes norm1a(x) but never uses it.
        x = x + attention(l, x, x, S, a1_wq, a1_bq, a1_wk, a1_bk, a1_wv, a1_bv,
                          a1_wp, a1_bp, masked=use_mask)
        # norm1b -> MLP1 -> residual
        h = layer_norm(x, n1b_g[l], n1b_b[l])
        h = gelu(proj(h, m1_w1, m1_b1, l))
        x = x + proj(h, m1_w2, m1_b2, l)
        # Cross-attention: norm2a on the query path; K/V from enc_output if present.
        qn = layer_norm(x, n2a_g[l], n2a_b[l])
        kv_in = enc if has_enc else qn
        x = x + attention(l, qn, kv_in, Se if has_enc else S,
                          a2_wq, a2_bq, a2_wk, a2_bk, a2_wv, a2_bv,
                          a2_wp, a2_bp, masked=False)
        # norm2b -> MLP2 -> residual
        h = layer_norm(x, n2b_g[l], n2b_b[l])
        h = gelu(proj(h, m2_w1, m2_b1, l))
        x = x + proj(h, m2_w2, m2_b2, l)
        return x

    # fori_loop (not a Python unroll) keeps only one layer of intermediates live.
    x = jax.lax.fori_loop(0, num_layers, layer_body, x)
    o_ref[...] = x


# ------------------------------ forward wrapper ----------------------------- #

def transformer_forward(latent, enc_output, params, *, is_decoder, num_head,
                        training=False, batch_tile=None):
    # training=False -> Dropout / StochasticDepth are identities (eval semantics).
    # TODO(synk): training-mode dropout / stochastic depth (RNG) not implemented.
    assert latent.ndim == 3, latent.shape
    if enc_output is not None:
        assert latent.shape[-1] == enc_output.shape[-1], (latent.shape, enc_output.shape)
    B, S, C = latent.shape
    assert C % num_head == 0, (C, num_head)
    # TODO(synk): the strided-gather scramble needs d_model % seq_len == 0 and
    # seq_len % 8 == 0 (true for the module defaults d_model=192, seq_len=16); the
    # general case would need an in-kernel relayout of the (C, S) attention output.
    assert C % S == 0, (C, S)
    assert S % 8 == 0, S

    num_layers = params["m1_w1"].shape[0]
    scale = float((C // num_head) ** (-0.5))
    use_mask = bool(is_decoder)
    has_enc = enc_output is not None
    Se = enc_output.shape[1] if has_enc else S
    if has_enc:
        assert Se % 8 == 0, Se

    Bt = batch_tile if batch_tile is not None else _pick_batch_tile(B, S)
    assert B % Bt == 0, (B, Bt)
    grid = (B // Bt,)

    # Fold batch into the matmul M dimension: (B, S, C) -> (B*S, C); each grid step
    # processes Bt batch elements = Bt*S rows through every projection / MLP matmul.
    args = [latent.reshape(B * S, C).astype(jnp.float32)]
    in_specs = [pl.BlockSpec((Bt * S, C), lambda g: (g, 0))]
    if has_enc:
        args.append(enc_output.reshape(B * Se, C).astype(jnp.float32))
        in_specs.append(pl.BlockSpec((Bt * Se, C), lambda g: (g, 0)))
    if use_mask:
        mask = jnp.triu(jnp.ones((S, S), jnp.float32), 1)   # 1 = future position
        args.append(mask)
        in_specs.append(pl.BlockSpec((S, S), lambda g: (0, 0)))
    for name in PARAM_ORDER:
        w = params[name]
        args.append(w)
        # Constant index map -> stacked weights stay VMEM-resident across grid steps.
        in_specs.append(pl.BlockSpec(w.shape, _const_index_map(w.ndim)))

    # VMEM budget: stacked bf16 weights (x2 buffers, conservative) + activation blocks
    # + scratch, clamped to [32 MiB, 96 MiB] (v5e/v6e have 128 MiB physical VMEM).
    # TODO(synk): for deep stacks on v7x (64 MiB VMEM), stream weights per layer
    # (layer grid axis or pl.Buffered(1)) instead of raising this limit.
    param_bytes = sum(int(params[n].size) * params[n].dtype.itemsize for n in PARAM_ORDER)
    act_bytes = 4 * 2 * (2 * Bt * S * C + (Bt * Se * C if has_enc else 0))
    scratch_bytes = 4 * Bt * C * S
    vmem_limit = int(min(max(2 * param_bytes + act_bytes + scratch_bytes + (4 << 20),
                             32 << 20), 96 << 20))

    kern = functools.partial(
        _transformer_kernel, num_layers=num_layers, d_model=C, seq_q=S, seq_kv=Se,
        batch_tile=Bt, scale=scale, use_mask=use_mask, has_enc=has_enc)

    out_flat = pl.pallas_call(
        kern,
        out_shape=jax.ShapeDtypeStruct((B * S, C), jnp.float32),
        grid=grid,
        in_specs=in_specs,
        out_specs=pl.BlockSpec((Bt * S, C), lambda g: (g, 0)),
        scratch_shapes=[pltpu.VMEM((Bt * C, S), jnp.float32)],
        compiler_params=pltpu.CompilerParams(
            dimension_semantics=("parallel",),       # batch blocks across v7x's 2 TCs
            vmem_limit_bytes=vmem_limit),
    )(*args)
    return out_flat.reshape(B, S, C)


# ------------------------------ parameter init ------------------------------ #

def _init_linear(key, fan_in, fan_out):
    kw, kb = jax.random.split(key)
    w = jax.random.normal(kw, (fan_in, fan_out), jnp.float32) * 0.02   # = torch W.T
    b = jax.random.normal(kb, (1, fan_out), jnp.float32) * 0.02
    return w, b


def _init_block_params(key, d, hidden):
    ka1, ka2, km1, km2 = jax.random.split(key, 4)
    p = {}
    for prefix, kattn in (("a1", ka1), ("a2", ka2)):
        kq, kk, kv, kp = jax.random.split(kattn, 4)
        for tag, ksub in (("q", kq), ("k", kk), ("v", kv), ("p", kp)):
            w, b = _init_linear(ksub, d, d)
            p[f"{prefix}_w{tag}"] = w
            p[f"{prefix}_b{tag}"] = b
    # layernorms (norm1a exists in torch but its output is never used -> omitted)
    for name in ("n1b", "n2a", "n2b"):
        p[name + "_g"] = jnp.ones((1, d), jnp.float32)
        p[name + "_b"] = jnp.zeros((1, d), jnp.float32)
    for name, kmlp in (("m1", km1), ("m2", km2)):
        k1, k2 = jax.random.split(kmlp)
        w1, b1 = _init_linear(k1, d, hidden)
        w2, b2 = _init_linear(k2, hidden, d)
        p.update({name + "_w1": w1, name + "_b1": b1,
                  name + "_w2": w2, name + "_b2": b2})
    return p


def init_transformer_params(key, num_layers, d, hidden):
    per_layer = [_init_block_params(k, d, hidden) for k in jax.random.split(key, num_layers)]
    stacked = {name: jnp.stack([p[name] for p in per_layer], axis=0) for name in PARAM_ORDER}
    # Matmul weights in bf16 (MXU-native, halves VMEM residency); biases / LN params f32.
    for name in stacked:
        if name.endswith(("_wq", "_wk", "_wv", "_wp", "_w1", "_w2")):
            stacked[name] = stacked[name].astype(jnp.bfloat16)
    return stacked


# ---------------------------- pure-JAX reference ---------------------------- #

def reference_forward(latent, enc_output, params, *, is_decoder, num_head):
    """f32 reproduction of the PyTorch module (eval mode), for validation."""
    B, S, C = latent.shape
    scale = float((C // num_head) ** (-0.5))
    mask = jnp.triu(jnp.ones((S, S), jnp.float32), 1) if is_decoder else None
    L = params["m1_w1"].shape[0]
    f32 = lambda a: a.astype(jnp.float32)

    def lin(h, w, b):
        return h @ f32(w) + f32(b)

    def ln(h, g, b):
        mu = h.mean(-1, keepdims=True)
        var = ((h - mu) ** 2).mean(-1, keepdims=True)
        return (h - mu) / jnp.sqrt(var + EPS) * f32(g) + f32(b)

    def attn_block(q_in, kv_in, l, pre, masked):
        q = lin(q_in, params[f"{pre}_wq"][l], params[f"{pre}_bq"][l]) * scale
        k = lin(kv_in, params[f"{pre}_wk"][l], params[f"{pre}_bk"][l])
        v = lin(kv_in, params[f"{pre}_wv"][l], params[f"{pre}_bv"][l])
        a = jnp.einsum("bqc,bkc->bqk", q, k)
        if masked:
            a = a + mask * (-1000000.0)
        a = jax.nn.softmax(a, axis=-1)
        if masked:
            a = a * mask                       # reference's post-softmax multiply
        y = jnp.einsum("bqk,bkc->bqc", a, v)
        y = jnp.swapaxes(y, 1, 2).reshape(q_in.shape[0], S, C)
        return lin(y, params[f"{pre}_wp"][l], params[f"{pre}_bp"][l])

    x = latent
    for l in range(L):
        x = x + attn_block(x, x, l, "a1", masked=is_decoder)
        h = ln(x, params["n1b_g"][l], params["n1b_b"][l])
        h = jax.nn.gelu(lin(h, params["m1_w1"][l], params["m1_b1"][l]), approximate=False)
        x = x + lin(h, params["m1_w2"][l], params["m1_b2"][l])
        qn = ln(x, params["n2a_g"][l], params["n2a_b"][l])
        kv = enc_output if enc_output is not None else qn
        x = x + attn_block(qn, kv, l, "a2", masked=False)
        h = ln(x, params["n2b_g"][l], params["n2b_b"][l])
        h = jax.nn.gelu(lin(h, params["m2_w1"][l], params["m2_b1"][l]), approximate=False)
        x = x + lin(h, params["m2_w2"][l], params["m2_b2"][l])
    return x


# ----------------------------------- main ----------------------------------- #

if __name__ == "__main__":
    B, SEQ, ENC_SEQ, D_MODEL, NUM_HEAD, MLP_EXP, NUM_LAYERS = 8, 8, 16, 32, 4, 4, 2
    hidden = D_MODEL * MLP_EXP

    key = jax.random.PRNGKey(0)
    k_params, k_latent, k_enc = jax.random.split(key, 3)
    params = init_transformer_params(k_params, NUM_LAYERS, D_MODEL, hidden)
    latent = jax.random.normal(k_latent, (B, SEQ, D_MODEL), jnp.float32)
    enc_output = jax.random.normal(k_enc, (B, ENC_SEQ, D_MODEL), jnp.float32)

    out = transformer_forward(latent, enc_output, params,
                              is_decoder=True, num_head=NUM_HEAD, training=False)
    out = jax.block_until_ready(out)
    assert out.shape == (B, SEQ, D_MODEL), out.shape
    assert bool(jnp.all(jnp.isfinite(out)))

    ref = reference_forward(latent, enc_output, params,
                            is_decoder=True, num_head=NUM_HEAD)
    max_err = float(jnp.max(jnp.abs(out - ref)))
    # bf16 matmuls + tanh-GELU + approx reciprocal vs the f32 / erf reference.
    assert max_err < 0.1, max_err
    print("KERNEL_OK")
</pallas_src>

<mosaic_0001>
module attributes {stable_mosaic.version = 11 : i64} {
  func.func @_transformer_kernel(%arg0: i32, %arg1: memref<32x32xf32, #tpu.memory_space<vmem>>, %arg2: memref<64x32xf32, #tpu.memory_space<vmem>>, %arg3: memref<8x8xf32, #tpu.memory_space<vmem>>, %arg4: memref<2x32x32xbf16, #tpu.memory_space<vmem>>, %arg5: memref<2x1x32xf32, #tpu.memory_space<vmem>>, %arg6: memref<2x32x32xbf16, #tpu.memory_space<vmem>>, %arg7: memref<2x1x32xf32, #tpu.memory_space<vmem>>, %arg8: memref<2x32x32xbf16, #tpu.memory_space<vmem>>, %arg9: memref<2x1x32xf32, #tpu.memory_space<vmem>>, %arg10: memref<2x32x32xbf16, #tpu.memory_space<vmem>>, %arg11: memref<2x1x32xf32, #tpu.memory_space<vmem>>, %arg12: memref<2x32x32xbf16, #tpu.memory_space<vmem>>, %arg13: memref<2x1x32xf32, #tpu.memory_space<vmem>>, %arg14: memref<2x32x32xbf16, #tpu.memory_space<vmem>>, %arg15: memref<2x1x32xf32, #tpu.memory_space<vmem>>, %arg16: memref<2x32x32xbf16, #tpu.memory_space<vmem>>, %arg17: memref<2x1x32xf32, #tpu.memory_space<vmem>>, %arg18: memref<2x32x32xbf16, #tpu.memory_space<vmem>>, %arg19: memref<2x1x32xf32, #tpu.memory_space<vmem>>, %arg20: memref<2x1x32xf32, #tpu.memory_space<vmem>>, %arg21: memref<2x1x32xf32, #tpu.memory_space<vmem>>, %arg22: memref<2x1x32xf32, #tpu.memory_space<vmem>>, %arg23: memref<2x1x32xf32, #tpu.memory_space<vmem>>, %arg24: memref<2x1x32xf32, #tpu.memory_space<vmem>>, %arg25: memref<2x1x32xf32, #tpu.memory_space<vmem>>, %arg26: memref<2x32x128xbf16, #tpu.memory_space<vmem>>, %arg27: memref<2x1x128xf32, #tpu.memory_space<vmem>>, %arg28: memref<2x128x32xbf16, #tpu.memory_space<vmem>>, %arg29: memref<2x1x32xf32, #tpu.memory_space<vmem>>, %arg30: memref<2x32x128xbf16, #tpu.memory_space<vmem>>, %arg31: memref<2x1x128xf32, #tpu.memory_space<vmem>>, %arg32: memref<2x128x32xbf16, #tpu.memory_space<vmem>>, %arg33: memref<2x1x32xf32, #tpu.memory_space<vmem>>, %arg34: memref<32x32xf32, #tpu.memory_space<vmem>>, %arg35: memref<128x8xf32, #tpu.memory_space<vmem>>) attributes {dimension_semantics = [#tpu.dimension_semantics<parallel>], iteration_bounds = array<i64: 2>, scalar_prefetch = 0 : i64, scratch_operands = 1 : i64, tpu.core_type = #tpu.core_type<tc>, window_params = [{transform_indices = @transform_0, window_bounds = array<i64: 32, 32>}, {transform_indices = @transform_1, window_bounds = array<i64: 64, 32>}, {pipeline_mode = #tpu.pipeline_mode<synchronous>, transform_indices = @transform_2, window_bounds = array<i64: 8, 8>}, {pipeline_mode = #tpu.pipeline_mode<synchronous>, transform_indices = @transform_3, window_bounds = array<i64: 2, 32, 32>}, {pipeline_mode = #tpu.pipeline_mode<synchronous>, transform_indices = @transform_4, window_bounds = array<i64: 2, 1, 32>}, {pipeline_mode = #tpu.pipeline_mode<synchronous>, transform_indices = @transform_5, window_bounds = array<i64: 2, 32, 32>}, {pipeline_mode = #tpu.pipeline_mode<synchronous>, transform_indices = @transform_6, window_bounds = array<i64: 2, 1, 32>}, {pipeline_mode = #tpu.pipeline_mode<synchronous>, transform_indices = @transform_7, window_bounds = array<i64: 2, 32, 32>}, {pipeline_mode = #tpu.pipeline_mode<synchronous>, transform_indices = @transform_8, window_bounds = array<i64: 2, 1, 32>}, {pipeline_mode = #tpu.pipeline_mode<synchronous>, transform_indices = @transform_9, window_bounds = array<i64: 2, 32, 32>}, {pipeline_mode = #tpu.pipeline_mode<synchronous>, transform_indices = @transform_10, window_bounds = array<i64: 2, 1, 32>}, {pipeline_mode = #tpu.pipeline_mode<synchronous>, transform_indices = @transform_11, window_bounds = array<i64: 2, 32, 32>}, {pipeline_mode = #tpu.pipeline_mode<synchronous>, transform_indices = @transform_12, window_bounds = array<i64: 2, 1, 32>}, {pipeline_mode = #tpu.pipeline_mode<synchronous>, transform_indices = @transform_13, window_bounds = array<i64: 2, 32, 32>}, {pipeline_mode = #tpu.pipeline_mode<synchronous>, transform_indices = @transform_14, window_bounds = array<i64: 2, 1, 32>}, {pipeline_mode = #tpu.pipeline_mode<synchronous>, transform_indices = @transform_15, window_bounds = array<i64: 2, 32, 32>}, {pipeline_mode = #tpu.pipeline_mode<synchronous>, transform_indices = @transform_16, window_bounds = array<i64: 2, 1, 32>}, {pipeline_mode = #tpu.pipeline_mode<synchronous>, transform_indices = @transform_17, window_bounds = array<i64: 2, 32, 32>}, {pipeline_mode = #tpu.pipeline_mode<synchronous>, transform_indices = @transform_18, window_bounds = array<i64: 2, 1, 32>}, {pipeline_mode = #tpu.pipeline_mode<synchronous>, transform_indices = @transform_19, window_bounds = array<i64: 2, 1, 32>}, {pipeline_mode = #tpu.pipeline_mode<synchronous>, transform_indices = @transform_20, window_bounds = array<i64: 2, 1, 32>}, {pipeline_mode = #tpu.pipeline_mode<synchronous>, transform_indices = @transform_21, window_bounds = array<i64: 2, 1, 32>}, {pipeline_mode = #tpu.pipeline_mode<synchronous>, transform_indices = @transform_22, window_bounds = array<i64: 2, 1, 32>}, {pipeline_mode = #tpu.pipeline_mode<synchronous>, transform_indices = @transform_23, window_bounds = array<i64: 2, 1, 32>}, {pipeline_mode = #tpu.pipeline_mode<synchronous>, transform_indices = @transform_24, window_bounds = array<i64: 2, 1, 32>}, {pipeline_mode = #tpu.pipeline_mode<synchronous>, transform_indices = @transform_25, window_bounds = array<i64: 2, 32, 128>}, {pipeline_mode = #tpu.pipeline_mode<synchronous>, transform_indices = @transform_26, window_bounds = array<i64: 2, 1, 128>}, {pipeline_mode = #tpu.pipeline_mode<synchronous>, transform_indices = @transform_27, window_bounds = array<i64: 2, 128, 32>}, {pipeline_mode = #tpu.pipeline_mode<synchronous>, transform_indices = @transform_28, window_bounds = array<i64: 2, 1, 32>}, {pipeline_mode = #tpu.pipeline_mode<synchronous>, transform_indices = @transform_29, window_bounds = array<i64: 2, 32, 128>}, {pipeline_mode = #tpu.pipeline_mode<synchronous>, transform_indices = @transform_30, window_bounds = array<i64: 2, 1, 128>}, {pipeline_mode = #tpu.pipeline_mode<synchronous>, transform_indices = @transform_31, window_bounds = array<i64: 2, 128, 32>}, {pipeline_mode = #tpu.pipeline_mode<synchronous>, transform_indices = @transform_32, window_bounds = array<i64: 2, 1, 32>}, {transform_indices = @transform_33, window_bounds = array<i64: 32, 32>}]} {
    %c0 = arith.constant 0 : index
    %c0_0 = arith.constant 0 : index
    %0 = vector.load %arg1[%c0, %c0_0] : memref<32x32xf32, #tpu.memory_space<vmem>>, vector<32x32xf32>
    %c0_1 = arith.constant 0 : index
    %c0_2 = arith.constant 0 : index
    %1 = vector.load %arg2[%c0_1, %c0_2] : memref<64x32xf32, #tpu.memory_space<vmem>>, vector<64x32xf32>
    %c0_3 = arith.constant 0 : index
    %c0_4 = arith.constant 0 : index
    %2 = vector.load %arg3[%c0_3, %c0_4] : memref<8x8xf32, #tpu.memory_space<vmem>>, vector<8x8xf32>
    %cst = arith.constant -1.000000e+06 : f32
    %3 = vector.broadcast %cst : f32 to vector<8x8xf32>
    %4 = arith.mulf %2, %3 : vector<8x8xf32>
    %c0_i32 = arith.constant 0 : i32
    %c2_i32 = arith.constant 2 : i32
    %5 = arith.addi %c0_i32, %c2_i32 : i32
    %c1_i32 = arith.constant 1 : i32
    %6 = scf.for %arg36 = %c0_i32 to %5 step %c1_i32 iter_args(%arg37 = %0) -> (vector<32x32xf32>)  : i32 {
      %8 = arith.truncf %arg37 : vector<32x32xf32> to vector<32x32xbf16>
      %9 = arith.index_cast %arg36 : i32 to index
      %c0_8 = arith.constant 0 : index
      %c0_9 = arith.constant 0 : index
      %10 = vector.load %arg4[%9, %c0_8, %c0_9] : memref<2x32x32xbf16, #tpu.memory_space<vmem>>, vector<1x32x32xbf16>
      %11 = vector.shape_cast %10 : vector<1x32x32xbf16> to vector<32x32xbf16>
      %cst_10 = arith.constant dense<0.000000e+00> : vector<32x32xf32>
      %12 = tpu.matmul %8, %11, %cst_10 {dimension_numbers = #tpu.dot_dimension_numbers<[1], [0], [0], [1], [0, 0, 1, 1], [], []>} : vector<32x32xbf16>, vector<32x32xbf16>, vector<32x32xf32> -> vector<32x32xf32>
      %13 = arith.index_cast %arg36 : i32 to index
      %c0_11 = arith.constant 0 : index
      %c0_12 = arith.constant 0 : index
      %14 = vector.load %arg5[%13, %c0_11, %c0_12] : memref<2x1x32xf32, #tpu.memory_space<vmem>>, vector<1x1x32xf32>
      %15 = vector.shape_cast %14 : vector<1x1x32xf32> to vector<1x32xf32>
      %16 = vector.broadcast %15 : vector<1x32xf32> to vector<32x32xf32>
      %17 = arith.addf %12, %16 : vector<32x32xf32>
      %cst_13 = arith.constant 0.353553385 : f32
      %18 = vector.broadcast %cst_13 : f32 to vector<32x32xf32>
      %19 = arith.mulf %17, %18 : vector<32x32xf32>
      %20 = arith.truncf %19 : vector<32x32xf32> to vector<32x32xbf16>
      %21 = vector.shape_cast %20 : vector<32x32xbf16> to vector<4x8x32xbf16>
      %22 = arith.truncf %arg37 : vector<32x32xf32> to vector<32x32xbf16>
      %23 = arith.index_cast %arg36 : i32 to index
      %c0_14 = arith.constant 0 : index
      %c0_15 = arith.constant 0 : index
      %24 = vector.load %arg6[%23, %c0_14, %c0_15] : memref<2x32x32xbf16, #tpu.memory_space<vmem>>, vector<1x32x32xbf16>
      %25 = vector.shape_cast %24 : vector<1x32x32xbf16> to vector<32x32xbf16>
      %cst_16 = arith.constant dense<0.000000e+00> : vector<32x32xf32>
      %26 = tpu.matmul %22, %25, %cst_16 {dimension_numbers = #tpu.dot_dimension_numbers<[1], [0], [0], [1], [0, 0, 1, 1], [], []>} : vector<32x32xbf16>, vector<32x32xbf16>, vector<32x32xf32> -> vector<32x32xf32>
      %27 = arith.index_cast %arg36 : i32 to index
      %c0_17 = arith.constant 0 : index
      %c0_18 = arith.constant 0 : index
      %28 = vector.load %arg7[%27, %c0_17, %c0_18] : memref<2x1x32xf32, #tpu.memory_space<vmem>>, vector<1x1x32xf32>
      %29 = vector.shape_cast %28 : vector<1x1x32xf32> to vector<1x32xf32>
      %30 = vector.broadcast %29 : vector<1x32xf32> to vector<32x32xf32>
      %31 = arith.addf %26, %30 : vector<32x32xf32>
      %32 = arith.truncf %31 : vector<32x32xf32> to vector<32x32xbf16>
      %33 = vector.shape_cast %32 : vector<32x32xbf16> to vector<4x8x32xbf16>
      %34 = arith.truncf %arg37 : vector<32x32xf32> to vector<32x32xbf16>
      %35 = arith.index_cast %arg36 : i32 to index
      %c0_19 = arith.constant 0 : index
      %c0_20 = arith.constant 0 : index
      %36 = vector.load %arg8[%35, %c0_19, %c0_20] : memref<2x32x32xbf16, #tpu.memory_space<vmem>>, vector<1x32x32xbf16>
      %37 = vector.shape_cast %36 : vector<1x32x32xbf16> to vector<32x32xbf16>
      %cst_21 = arith.constant dense<0.000000e+00> : vector<32x32xf32>
      %38 = tpu.matmul %34, %37, %cst_21 {dimension_numbers = #tpu.dot_dimension_numbers<[1], [0], [0], [1], [0, 0, 1, 1], [], []>} : vector<32x32xbf16>, vector<32x32xbf16>, vector<32x32xf32> -> vector<32x32xf32>
      %39 = arith.index_cast %arg36 : i32 to index
      %c0_22 = arith.constant 0 : index
      %c0_23 = arith.constant 0 : index
      %40 = vector.load %arg9[%39, %c0_22, %c0_23] : memref<2x1x32xf32, #tpu.memory_space<vmem>>, vector<1x1x32xf32>
      %41 = vector.shape_cast %40 : vector<1x1x32xf32> to vector<1x32xf32>
      %42 = vector.broadcast %41 : vector<1x32xf32> to vector<32x32xf32>
      %43 = arith.addf %38, %42 : vector<32x32xf32>
      %44 = arith.truncf %43 : vector<32x32xf32> to vector<32x32xbf16>
      %45 = vector.shape_cast %44 : vector<32x32xbf16> to vector<4x8x32xbf16>
      "tpu.trace_start"() <{level = 10 : i32, message = "bqd,bkd->bqk"}> : () -> ()
      %cst_24 = arith.constant dense<0.000000e+00> : vector<4x8x8xf32>
      %46 = tpu.matmul %21, %33, %cst_24 {dimension_numbers = #tpu.dot_dimension_numbers<[2], [2], [1], [1], [0, 0, 0, 1, 1, 1], [0], [0]>} : vector<4x8x32xbf16>, vector<4x8x32xbf16>, vector<4x8x8xf32> -> vector<4x8x8xf32>
      "tpu.trace_stop"() : () -> ()
      %47 = vector.shape_cast %4 : vector<8x8xf32> to vector<1x8x8xf32>
      %48 = vector.broadcast %47 : vector<1x8x8xf32> to vector<4x8x8xf32>
      %49 = arith.addf %46, %48 : vector<4x8x8xf32>
      %cst_25 = arith.constant dense<0xFF800000> : vector<4x8xf32>
      %50 = vector.multi_reduction <maximumf>, %49, %cst_25 [2] : vector<4x8x8xf32> to vector<4x8xf32>
      %51 = vector.shape_cast %50 : vector<4x8xf32> to vector<4x8x1xf32>
      %52 = vector.broadcast %51 : vector<4x8x1xf32> to vector<4x8x8xf32>
      %53 = arith.subf %49, %52 : vector<4x8x8xf32>
      %54 = math.exp %53 : vector<4x8x8xf32>
      %cst_26 = arith.constant dense<0.000000e+00> : vector<4x8xf32>
      %55 = vector.multi_reduction <add>, %54, %cst_26 [2] : vector<4x8x8xf32> to vector<4x8xf32>
      %56 = vector.shape_cast %55 : vector<4x8xf32> to vector<4x8x1xf32>
      %57 = tpu.reciprocal %56 {approx = true} : vector<4x8x1xf32> -> vector<4x8x1xf32>
      %58 = vector.broadcast %57 : vector<4x8x1xf32> to vector<4x8x8xf32>
      %59 = arith.mulf %54, %58 : vector<4x8x8xf32>
      %60 = vector.shape_cast %2 : vector<8x8xf32> to vector<1x8x8xf32>
      %61 = vector.broadcast %60 : vector<1x8x8xf32> to vector<4x8x8xf32>
      %62 = arith.mulf %59, %61 : vector<4x8x8xf32>
      %63 = arith.truncf %62 : vector<4x8x8xf32> to vector<4x8x8xbf16>
      "tpu.trace_start"() <{level = 10 : i32, message = "bkd,bqk->bdq"}> : () -> ()
      %cst_27 = arith.constant dense<0.000000e+00> : vector<4x32x8xf32>
      %64 = tpu.matmul %45, %63, %cst_27 {dimension_numbers = #tpu.dot_dimension_numbers<[1], [2], [2], [1], [0, 0, 0, 2, 1, 1], [0], [0]>} : vector<4x8x32xbf16>, vector<4x8x8xbf16>, vector<4x32x8xf32> -> vector<4x32x8xf32>
      "tpu.trace_stop"() : () -> ()
      %65 = vector.shape_cast %64 : vector<4x32x8xf32> to vector<128x8xf32>
      %c0_28 = arith.constant 0 : index
      %c0_29 = arith.constant 0 : index
      %66 = vector.load %arg35[%c0_28, %c0_29] : memref<128x8xf32, #tpu.memory_space<vmem>>, vector<128x8xf32>
      tpu.vector_store %arg35[%c0_28, %c0_29], %65 {strides = array<i32>} : memref<128x8xf32, #tpu.memory_space<vmem>>, vector<128x8xf32>,
      %c0_30 = arith.constant 0 : index
      %c0_31 = arith.constant 0 : index
      %67 = tpu.strided_load %arg35[%c0_30, %c0_31] {strides = array<i32: 4, 1>} : memref<128x8xf32, #tpu.memory_space<vmem>>, vector<32x8xf32>
      %c1 = arith.constant 1 : index
      %c0_32 = arith.constant 0 : index
      %68 = tpu.strided_load %arg35[%c1, %c0_32] {strides = array<i32: 4, 1>} : memref<128x8xf32, #tpu.memory_space<vmem>>, vector<32x8xf32>
      %c2 = arith.constant 2 : index
      %c0_33 = arith.constant 0 : index
      %69 = tpu.strided_load %arg35[%c2, %c0_33] {strides = array<i32: 4, 1>} : memref<128x8xf32, #tpu.memory_space<vmem>>, vector<32x8xf32>
      %c3 = arith.constant 3 : index
      %c0_34 = arith.constant 0 : index
      %70 = tpu.strided_load %arg35[%c3, %c0_34] {strides = array<i32: 4, 1>} : memref<128x8xf32, #tpu.memory_space<vmem>>, vector<32x8xf32>
      %71 = tpu.concatenate %67, %68, %69, %70 in 1 : vector<32x8xf32>, vector<32x8xf32>, vector<32x8xf32>, vector<32x8xf32> -> vector<32x32xf32>
      %72 = arith.truncf %71 : vector<32x32xf32> to vector<32x32xbf16>
      %73 = arith.index_cast %arg36 : i32 to index
      %c0_35 = arith.constant 0 : index
      %c0_36 = arith.constant 0 : index
      %74 = vector.load %arg10[%73, %c0_35, %c0_36] : memref<2x32x32xbf16, #tpu.memory_space<vmem>>, vector<1x32x32xbf16>
      %75 = vector.shape_cast %74 : vector<1x32x32xbf16> to vector<32x32xbf16>
      %cst_37 = arith.constant dense<0.000000e+00> : vector<32x32xf32>
      %76 = tpu.matmul %72, %75, %cst_37 {dimension_numbers = #tpu.dot_dimension_numbers<[1], [0], [0], [1], [0, 0, 1, 1], [], []>} : vector<32x32xbf16>, vector<32x32xbf16>, vector<32x32xf32> -> vector<32x32xf32>
      %77 = arith.index_cast %arg36 : i32 to index
      %c0_38 = arith.constant 0 : index
      %c0_39 = arith.constant 0 : index
      %78 = vector.load %arg11[%77, %c0_38, %c0_39] : memref<2x1x32xf32, #tpu.memory_space<vmem>>, vector<1x1x32xf32>
      %79 = vector.shape_cast %78 : vector<1x1x32xf32> to vector<1x32xf32>
      %80 = vector.broadcast %79 : vector<1x32xf32> to vector<32x32xf32>
      %81 = arith.addf %76, %80 : vector<32x32xf32>
      %82 = arith.addf %arg37, %81 : vector<32x32xf32>
      %83 = arith.index_cast %arg36 : i32 to index
      %c0_40 = arith.constant 0 : index
      %c0_41 = arith.constant 0 : index
      %84 = vector.load %arg20[%83, %c0_40, %c0_41] : memref<2x1x32xf32, #tpu.memory_space<vmem>>, vector<1x1x32xf32>
      %85 = vector.shape_cast %84 : vector<1x1x32xf32> to vector<1x32xf32>
      %86 = arith.index_cast %arg36 : i32 to index
      %c0_42 = arith.constant 0 : index
      %c0_43 = arith.constant 0 : index
      %87 = vector.load %arg21[%86, %c0_42, %c0_43] : memref<2x1x32xf32, #tpu.memory_space<vmem>>, vector<1x1x32xf32>
      %88 = vector.shape_cast %87 : vector<1x1x32xf32> to vector<1x32xf32>
      %cst_44 = arith.constant dense<0.000000e+00> : vector<32xf32>
      %89 = vector.multi_reduction <add>, %82, %cst_44 [1] : vector<32x32xf32> to vector<32xf32>
      %90 = vector.shape_cast %89 : vector<32xf32> to vector<32x1xf32>
      %cst_45 = arith.constant 3.200000e+01 : f32
      %91 = vector.broadcast %cst_45 : f32 to vector<32x1xf32>
      %92 = arith.divf %90, %91 : vector<32x1xf32>
      %93 = vector.broadcast %92 : vector<32x1xf32> to vector<32x32xf32>
      %94 = arith.subf %82, %93 : vector<32x32xf32>
      %95 = arith.mulf %94, %94 : vector<32x32xf32>
      %cst_46 = arith.constant dense<0.000000e+00> : vector<32xf32>
      %96 = vector.multi_reduction <add>, %95, %cst_46 [1] : vector<32x32xf32> to vector<32xf32>
      %97 = vector.shape_cast %96 : vector<32xf32> to vector<32x1xf32>
      %cst_47 = arith.constant 3.200000e+01 : f32
      %98 = vector.broadcast %cst_47 : f32 to vector<32x1xf32>
      %99 = arith.divf %97, %98 : vector<32x1xf32>
      %100 = vector.broadcast %92 : vector<32x1xf32> to vector<32x32xf32>
      %101 = arith.subf %82, %100 : vector<32x32xf32>
      %cst_48 = arith.constant 9.99999974E-6 : f32
      %102 = vector.broadcast %cst_48 : f32 to vector<32x1xf32>
      %103 = arith.addf %99, %102 : vector<32x1xf32>
      %104 = math.rsqrt %103 : vector<32x1xf32>
      %105 = vector.broadcast %104 : vector<32x1xf32> to vector<32x32xf32>
      %106 = arith.mulf %101, %105 : vector<32x32xf32>
      %107 = vector.broadcast %85 : vector<1x32xf32> to vector<32x32xf32>
      %108 = arith.mulf %106, %107 : vector<32x32xf32>
      %109 = vector.broadcast %88 : vector<1x32xf32> to vector<32x32xf32>
      %110 = arith.addf %108, %109 : vector<32x32xf32>
      %111 = arith.truncf %110 : vector<32x32xf32> to vector<32x32xbf16>
      %112 = arith.index_cast %arg36 : i32 to index
      %c0_49 = arith.constant 0 : index
      %c0_50 = arith.constant 0 : index
      %113 = vector.load %arg26[%112, %c0_49, %c0_50] : memref<2x32x128xbf16, #tpu.memory_space<vmem>>, vector<1x32x128xbf16>
      %114 = vector.shape_cast %113 : vector<1x32x128xbf16> to vector<32x128xbf16>
      %cst_51 = arith.constant dense<0.000000e+00> : vector<32x128xf32>
      %115 = tpu.matmul %111, %114, %cst_51 {dimension_numbers = #tpu.dot_dimension_numbers<[1], [0], [0], [1], [0, 0, 1, 1], [], []>} : vector<32x32xbf16>, vector<32x128xbf16>, vector<32x128xf32> -> vector<32x128xf32>
      %116 = arith.index_cast %arg36 : i32 to index
      %c0_52 = arith.constant 0 : index
      %c0_53 = arith.constant 0 : index
      %117 = vector.load %arg27[%116, %c0_52, %c0_53] : memref<2x1x128xf32, #tpu.memory_space<vmem>>, vector<1x1x128xf32>
      %118 = vector.shape_cast %117 : vector<1x1x128xf32> to vector<1x128xf32>
      %119 = vector.broadcast %118 : vector<1x128xf32> to vector<32x128xf32>
      %120 = arith.addf %115, %119 : vector<32x128xf32>
      %cst_54 = arith.constant 5.000000e-01 : f32
      %121 = vector.broadcast %cst_54 : f32 to vector<32x128xf32>
      %122 = arith.mulf %121, %120 : vector<32x128xf32>
      %cst_55 = arith.constant 4.471500e-02 : f32
      %123 = vector.broadcast %cst_55 : f32 to vector<32x128xf32>
      %124 = arith.mulf %123, %120 : vector<32x128xf32>
      %125 = arith.mulf %124, %120 : vector<32x128xf32>
      %126 = arith.mulf %125, %120 : vector<32x128xf32>
      %127 = arith.addf %120, %126 : vector<32x128xf32>
      %cst_56 = arith.constant 0.797884583 : f32
      %128 = vector.broadcast %cst_56 : f32 to vector<32x128xf32>
      %129 = arith.mulf %128, %127 : vector<32x128xf32>
      %130 = math.tanh %129 : vector<32x128xf32>
      %cst_57 = arith.constant 1.000000e+00 : f32
      %131 = vector.broadcast %cst_57 : f32 to vector<32x128xf32>
      %132 = arith.addf %131, %130 : vector<32x128xf32>
      %133 = arith.mulf %122, %132 : vector<32x128xf32>
      %134 = arith.truncf %133 : vector<32x128xf32> to vector<32x128xbf16>
      %135 = arith.index_cast %arg36 : i32 to index
      %c0_58 = arith.constant 0 : index
      %c0_59 = arith.constant 0 : index
      %136 = vector.load %arg28[%135, %c0_58, %c0_59] : memref<2x128x32xbf16, #tpu.memory_space<vmem>>, vector<1x128x32xbf16>
      %137 = vector.shape_cast %136 : vector<1x128x32xbf16> to vector<128x32xbf16>
      %cst_60 = arith.constant dense<0.000000e+00> : vector<32x32xf32>
      %138 = tpu.matmul %134, %137, %cst_60 {dimension_numbers = #tpu.dot_dimension_numbers<[1], [0], [0], [1], [0, 0, 1, 1], [], []>} : vector<32x128xbf16>, vector<128x32xbf16>, vector<32x32xf32> -> vector<32x32xf32>
      %139 = arith.index_cast %arg36 : i32 to index
      %c0_61 = arith.constant 0 : index
      %c0_62 = arith.constant 0 : index
      %140 = vector.load %arg29[%139, %c0_61, %c0_62] : memref<2x1x32xf32, #tpu.memory_space<vmem>>, vector<1x1x32xf32>
      %141 = vector.shape_cast %140 : vector<1x1x32xf32> to vector<1x32xf32>
      %142 = vector.broadcast %141 : vector<1x32xf32> to vector<32x32xf32>
      %143 = arith.addf %138, %142 : vector<32x32xf32>
      %144 = arith.addf %82, %143 : vector<32x32xf32>
      %145 = arith.index_cast %arg36 : i32 to index
      %c0_63 = arith.constant 0 : index
      %c0_64 = arith.constant 0 : index
      %146 = vector.load %arg22[%145, %c0_63, %c0_64] : memref<2x1x32xf32, #tpu.memory_space<vmem>>, vector<1x1x32xf32>
      %147 = vector.shape_cast %146 : vector<1x1x32xf32> to vector<1x32xf32>
      %148 = arith.index_cast %arg36 : i32 to index
      %c0_65 = arith.constant 0 : index
      %c0_66 = arith.constant 0 : index
      %149 = vector.load %arg23[%148, %c0_65, %c0_66] : memref<2x1x32xf32, #tpu.memory_space<vmem>>, vector<1x1x32xf32>
      %150 = vector.shape_cast %149 : vector<1x1x32xf32> to vector<1x32xf32>
      %cst_67 = arith.constant dense<0.000000e+00> : vector<32xf32>
      %151 = vector.multi_reduction <add>, %144, %cst_67 [1] : vector<32x32xf32> to vector<32xf32>
      %152 = vector.shape_cast %151 : vector<32xf32> to vector<32x1xf32>
      %cst_68 = arith.constant 3.200000e+01 : f32
      %153 = vector.broadcast %cst_68 : f32 to vector<32x1xf32>
      %154 = arith.divf %152, %153 : vector<32x1xf32>
      %155 = vector.broadcast %154 : vector<32x1xf32> to vector<32x32xf32>
      %156 = arith.subf %144, %155 : vector<32x32xf32>
      %157 = arith.mulf %156, %156 : vector<32x32xf32>
      %cst_69 = arith.constant dense<0.000000e+00> : vector<32xf32>
      %158 = vector.multi_reduction <add>, %157, %cst_69 [1] : vector<32x32xf32> to vector<32xf32>
      %159 = vector.shape_cast %158 : vector<32xf32> to vector<32x1xf32>
      %cst_70 = arith.constant 3.200000e+01 : f32
      %160 = vector.broadcast %cst_70 : f32 to vector<32x1xf32>
      %161 = arith.divf %159, %160 : vector<32x1xf32>
      %162 = vector.broadcast %154 : vector<32x1xf32> to vector<32x32xf32>
      %163 = arith.subf %144, %162 : vector<32x32xf32>
      %cst_71 = arith.constant 9.99999974E-6 : f32
      %164 = vector.broadcast %cst_71 : f32 to vector<32x1xf32>
      %165 = arith.addf %161, %164 : vector<32x1xf32>
      %166 = math.rsqrt %165 : vector<32x1xf32>
      %167 = vector.broadcast %166 : vector<32x1xf32> to vector<32x32xf32>
      %168 = arith.mulf %163, %167 : vector<32x32xf32>
      %169 = vector.broadcast %147 : vector<1x32xf32> to vector<32x32xf32>
      %170 = arith.mulf %168, %169 : vector<32x32xf32>
      %171 = vector.broadcast %150 : vector<1x32xf32> to vector<32x32xf32>
      %172 = arith.addf %170, %171 : vector<32x32xf32>
      %173 = arith.truncf %172 : vector<32x32xf32> to vector<32x32xbf16>
      %174 = arith.index_cast %arg36 : i32 to index
      %c0_72 = arith.constant 0 : index
      %c0_73 = arith.constant 0 : index
      %175 = vector.load %arg12[%174, %c0_72, %c0_73] : memref<2x32x32xbf16, #tpu.memory_space<vmem>>, vector<1x32x32xbf16>
      %176 = vector.shape_cast %175 : vector<1x32x32xbf16> to vector<32x32xbf16>
      %cst_74 = arith.constant dense<0.000000e+00> : vector<32x32xf32>
      %177 = tpu.matmul %173, %176, %cst_74 {dimension_numbers = #tpu.dot_dimension_numbers<[1], [0], [0], [1], [0, 0, 1, 1], [], []>} : vector<32x32xbf16>, vector<32x32xbf16>, vector<32x32xf32> -> vector<32x32xf32>
      %178 = arith.index_cast %arg36 : i32 to index
      %c0_75 = arith.constant 0 : index
      %c0_76 = arith.constant 0 : index
      %179 = vector.load %arg13[%178, %c0_75, %c0_76] : memref<2x1x32xf32, #tpu.memory_space<vmem>>, vector<1x1x32xf32>
      %180 = vector.shape_cast %179 : vector<1x1x32xf32> to vector<1x32xf32>
      %181 = vector.broadcast %180 : vector<1x32xf32> to vector<32x32xf32>
      %182 = arith.addf %177, %181 : vector<32x32xf32>
      %cst_77 = arith.constant 0.353553385 : f32
      %183 = vector.broadcast %cst_77 : f32 to vector<32x32xf32>
      %184 = arith.mulf %182, %183 : vector<32x32xf32>
      %185 = arith.truncf %184 : vector<32x32xf32> to vector<32x32xbf16>
      %186 = vector.shape_cast %185 : vector<32x32xbf16> to vector<4x8x32xbf16>
      %187 = arith.truncf %1 : vector<64x32xf32> to vector<64x32xbf16>
      %188 = arith.index_cast %arg36 : i32 to index
      %c0_78 = arith.constant 0 : index
      %c0_79 = arith.constant 0 : index
      %189 = vector.load %arg14[%188, %c0_78, %c0_79] : memref<2x32x32xbf16, #tpu.memory_space<vmem>>, vector<1x32x32xbf16>
      %190 = vector.shape_cast %189 : vector<1x32x32xbf16> to vector<32x32xbf16>
      %cst_80 = arith.constant dense<0.000000e+00> : vector<64x32xf32>
      %191 = tpu.matmul %187, %190, %cst_80 {dimension_numbers = #tpu.dot_dimension_numbers<[1], [0], [0], [1], [0, 0, 1, 1], [], []>} : vector<64x32xbf16>, vector<32x32xbf16>, vector<64x32xf32> -> vector<64x32xf32>
      %192 = arith.index_cast %arg36 : i32 to index
      %c0_81 = arith.constant 0 : index
      %c0_82 = arith.constant 0 : index
      %193 = vector.load %arg15[%192, %c0_81, %c0_82] : memref<2x1x32xf32, #tpu.memory_space<vmem>>, vector<1x1x32xf32>
      %194 = vector.shape_cast %193 : vector<1x1x32xf32> to vector<1x32xf32>
      %195 = vector.broadcast %194 : vector<1x32xf32> to vector<64x32xf32>
      %196 = arith.addf %191, %195 : vector<64x32xf32>
      %197 = arith.truncf %196 : vector<64x32xf32> to vector<64x32xbf16>
      %198 = vector.shape_cast %197 : vector<64x32xbf16> to vector<4x16x32xbf16>
      %199 = arith.truncf %1 : vector<64x32xf32> to vector<64x32xbf16>
      %200 = arith.index_cast %arg36 : i32 to index
      %c0_83 = arith.constant 0 : index
      %c0_84 = arith.constant 0 : index
      %201 = vector.load %arg16[%200, %c0_83, %c0_84] : memref<2x32x32xbf16, #tpu.memory_space<vmem>>, vector<1x32x32xbf16>
      %202 = vector.shape_cast %201 : vector<1x32x32xbf16> to vector<32x32xbf16>
      %cst_85 = arith.constant dense<0.000000e+00> : vector<64x32xf32>
      %203 = tpu.matmul %199, %202, %cst_85 {dimension_numbers = #tpu.dot_dimension_numbers<[1], [0], [0], [1], [0, 0, 1, 1], [], []>} : vector<64x32xbf16>, vector<32x32xbf16>, vector<64x32xf32> -> vector<64x32xf32>
      %204 = arith.index_cast %arg36 : i32 to index
      %c0_86 = arith.constant 0 : index
      %c0_87 = arith.constant 0 : index
      %205 = vector.load %arg17[%204, %c0_86, %c0_87] : memref<2x1x32xf32, #tpu.memory_space<vmem>>, vector<1x1x32xf32>
      %206 = vector.shape_cast %205 : vector<1x1x32xf32> to vector<1x32xf32>
      %207 = vector.broadcast %206 : vector<1x32xf32> to vector<64x32xf32>
      %208 = arith.addf %203, %207 : vector<64x32xf32>
      %209 = arith.truncf %208 : vector<64x32xf32> to vector<64x32xbf16>
      %210 = vector.shape_cast %209 : vector<64x32xbf16> to vector<4x16x32xbf16>
      "tpu.trace_start"() <{level = 10 : i32, message = "bqd,bkd->bqk"}> : () -> ()
      %cst_88 = arith.constant dense<0.000000e+00> : vector<4x8x16xf32>
      %211 = tpu.matmul %186, %198, %cst_88 {dimension_numbers = #tpu.dot_dimension_numbers<[2], [2], [1], [1], [0, 0, 0, 1, 1, 1], [0], [0]>} : vector<4x8x32xbf16>, vector<4x16x32xbf16>, vector<4x8x16xf32> -> vector<4x8x16xf32>
      "tpu.trace_stop"() : () -> ()
      %cst_89 = arith.constant dense<0xFF800000> : vector<4x8xf32>
      %212 = vector.multi_reduction <maximumf>, %211, %cst_89 [2] : vector<4x8x16xf32> to vector<4x8xf32>
      %213 = vector.shape_cast %212 : vector<4x8xf32> to vector<4x8x1xf32>
      %214 = vector.broadcast %213 : vector<4x8x1xf32> to vector<4x8x16xf32>
      %215 = arith.subf %211, %214 : vector<4x8x16xf32>
      %216 = math.exp %215 : vector<4x8x16xf32>
      %cst_90 = arith.constant dense<0.000000e+00> : vector<4x8xf32>
      %217 = vector.multi_reduction <add>, %216, %cst_90 [2] : vector<4x8x16xf32> to vector<4x8xf32>
      %218 = vector.shape_cast %217 : vector<4x8xf32> to vector<4x8x1xf32>
      %219 = tpu.reciprocal %218 {approx = true} : vector<4x8x1xf32> -> vector<4x8x1xf32>
      %220 = vector.broadcast %219 : vector<4x8x1xf32> to vector<4x8x16xf32>
      %221 = arith.mulf %216, %220 : vector<4x8x16xf32>
      %222 = arith.truncf %221 : vector<4x8x16xf32> to vector<4x8x16xbf16>
      "tpu.trace_start"() <{level = 10 : i32, message = "bkd,bqk->bdq"}> : () -> ()
      %cst_91 = arith.constant dense<0.000000e+00> : vector<4x32x8xf32>
      %223 = tpu.matmul %210, %222, %cst_91 {dimension_numbers = #tpu.dot_dimension_numbers<[1], [2], [2], [1], [0, 0, 0, 2, 1, 1], [0], [0]>} : vector<4x16x32xbf16>, vector<4x8x16xbf16>, vector<4x32x8xf32> -> vector<4x32x8xf32>
      "tpu.trace_stop"() : () -> ()
      %224 = vector.shape_cast %223 : vector<4x32x8xf32> to vector<128x8xf32>
      %c0_92 = arith.constant 0 : index
      %c0_93 = arith.constant 0 : index
      %225 = vector.load %arg35[%c0_92, %c0_93] : memref<128x8xf32, #tpu.memory_space<vmem>>, vector<128x8xf32>
      tpu.vector_store %arg35[%c0_92, %c0_93], %224 {strides = array<i32>} : memref<128x8xf32, #tpu.memory_space<vmem>>, vector<128x8xf32>,
      %c0_94 = arith.constant 0 : index
      %c0_95 = arith.constant 0 : index
      %226 = tpu.strided_load %arg35[%c0_94, %c0_95] {strides = array<i32: 4, 1>} : memref<128x8xf32, #tpu.memory_space<vmem>>, vector<32x8xf32>
      %c1_96 = arith.constant 1 : index
      %c0_97 = arith.constant 0 : index
      %227 = tpu.strided_load %arg35[%c1_96, %c0_97] {strides = array<i32: 4, 1>} : memref<128x8xf32, #tpu.memory_space<vmem>>, vector<32x8xf32>
      %c2_98 = arith.constant 2 : index
      %c0_99 = arith.constant 0 : index
      %228 = tpu.strided_load %arg35[%c2_98, %c0_99] {strides = array<i32: 4, 1>} : memref<128x8xf32, #tpu.memory_space<vmem>>, vector<32x8xf32>
      %c3_100 = arith.constant 3 : index
      %c0_101 = arith.constant 0 : index
      %229 = tpu.strided_load %arg35[%c3_100, %c0_101] {strides = array<i32: 4, 1>} : memref<128x8xf32, #tpu.memory_space<vmem>>, vector<32x8xf32>
      %230 = tpu.concatenate %226, %227, %228, %229 in 1 : vector<32x8xf32>, vector<32x8xf32>, vector<32x8xf32>, vector<32x8xf32> -> vector<32x32xf32>
      %231 = arith.truncf %230 : vector<32x32xf32> to vector<32x32xbf16>
      %232 = arith.index_cast %arg36 : i32 to index
      %c0_102 = arith.constant 0 : index
      %c0_103 = arith.constant 0 : index
      %233 = vector.load %arg18[%232, %c0_102, %c0_103] : memref<2x32x32xbf16, #tpu.memory_space<vmem>>, vector<1x32x32xbf16>
      %234 = vector.shape_cast %233 : vector<1x32x32xbf16> to vector<32x32xbf16>
      %cst_104 = arith.constant dense<0.000000e+00> : vector<32x32xf32>
      %235 = tpu.matmul %231, %234, %cst_104 {dimension_numbers = #tpu.dot_dimension_numbers<[1], [0], [0], [1], [0, 0, 1, 1], [], []>} : vector<32x32xbf16>, vector<32x32xbf16>, vector<32x32xf32> -> vector<32x32xf32>
      %236 = arith.index_cast %arg36 : i32 to index
      %c0_105 = arith.constant 0 : index
      %c0_106 = arith.constant 0 : index
      %237 = vector.load %arg19[%236, %c0_105, %c0_106] : memref<2x1x32xf32, #tpu.memory_space<vmem>>, vector<1x1x32xf32>
      %238 = vector.shape_cast %237 : vector<1x1x32xf32> to vector<1x32xf32>
      %239 = vector.broadcast %238 : vector<1x32xf32> to vector<32x32xf32>
      %240 = arith.addf %235, %239 : vector<32x32xf32>
      %241 = arith.addf %144, %240 : vector<32x32xf32>
      %242 = arith.index_cast %arg36 : i32 to index
      %c0_107 = arith.constant 0 : index
      %c0_108 = arith.constant 0 : index
      %243 = vector.load %arg24[%242, %c0_107, %c0_108] : memref<2x1x32xf32, #tpu.memory_space<vmem>>, vector<1x1x32xf32>
      %244 = vector.shape_cast %243 : vector<1x1x32xf32> to vector<1x32xf32>
      %245 = arith.index_cast %arg36 : i32 to index
      %c0_109 = arith.constant 0 : index
      %c0_110 = arith.constant 0 : index
      %246 = vector.load %arg25[%245, %c0_109, %c0_110] : memref<2x1x32xf32, #tpu.memory_space<vmem>>, vector<1x1x32xf32>
      %247 = vector.shape_cast %246 : vector<1x1x32xf32> to vector<1x32xf32>
      %cst_111 = arith.constant dense<0.000000e+00> : vector<32xf32>
      %248 = vector.multi_reduction <add>, %241, %cst_111 [1] : vector<32x32xf32> to vector<32xf32>
      %249 = vector.shape_cast %248 : vector<32xf32> to vector<32x1xf32>
      %cst_112 = arith.constant 3.200000e+01 : f32
      %250 = vector.broadcast %cst_112 : f32 to vector<32x1xf32>
      %251 = arith.divf %249, %250 : vector<32x1xf32>
      %252 = vector.broadcast %251 : vector<32x1xf32> to vector<32x32xf32>
      %253 = arith.subf %241, %252 : vector<32x32xf32>
      %254 = arith.mulf %253, %253 : vector<32x32xf32>
      %cst_113 = arith.constant dense<0.000000e+00> : vector<32xf32>
      %255 = vector.multi_reduction <add>, %254, %cst_113 [1] : vector<32x32xf32> to vector<32xf32>
      %256 = vector.shape_cast %255 : vector<32xf32> to vector<32x1xf32>
      %cst_114 = arith.constant 3.200000e+01 : f32
      %257 = vector.broadcast %cst_114 : f32 to vector<32x1xf32>
      %258 = arith.divf %256, %257 : vector<32x1xf32>
      %259 = vector.broadcast %251 : vector<32x1xf32> to vector<32x32xf32>
      %260 = arith.subf %241, %259 : vector<32x32xf32>
      %cst_115 = arith.constant 9.99999974E-6 : f32
      %261 = vector.broadcast %cst_115 : f32 to vector<32x1xf32>
      %262 = arith.addf %258, %261 : vector<32x1xf32>
      %263 = math.rsqrt %262 : vector<32x1xf32>
      %264 = vector.broadcast %263 : vector<32x1xf32> to vector<32x32xf32>
      %265 = arith.mulf %260, %264 : vector<32x32xf32>
      %266 = vector.broadcast %244 : vector<1x32xf32> to vector<32x32xf32>
      %267 = arith.mulf %265, %266 : vector<32x32xf32>
      %268 = vector.broadcast %247 : vector<1x32xf32> to vector<32x32xf32>
      %269 = arith.addf %267, %268 : vector<32x32xf32>
      %270 = arith.truncf %269 : vector<32x32xf32> to vector<32x32xbf16>
      %271 = arith.index_cast %arg36 : i32 to index
      %c0_116 = arith.constant 0 : index
      %c0_117 = arith.constant 0 : index
      %272 = vector.load %arg30[%271, %c0_116, %c0_117] : memref<2x32x128xbf16, #tpu.memory_space<vmem>>, vector<1x32x128xbf16>
      %273 = vector.shape_cast %272 : vector<1x32x128xbf16> to vector<32x128xbf16>
      %cst_118 = arith.constant dense<0.000000e+00> : vector<32x128xf32>
      %274 = tpu.matmul %270, %273, %cst_118 {dimension_numbers = #tpu.dot_dimension_numbers<[1], [0], [0], [1], [0, 0, 1, 1], [], []>} : vector<32x32xbf16>, vector<32x128xbf16>, vector<32x128xf32> -> vector<32x128xf32>
      %275 = arith.index_cast %arg36 : i32 to index
      %c0_119 = arith.constant 0 : index
      %c0_120 = arith.constant 0 : index
      %276 = vector.load %arg31[%275, %c0_119, %c0_120] : memref<2x1x128xf32, #tpu.memory_space<vmem>>, vector<1x1x128xf32>
      %277 = vector.shape_cast %276 : vector<1x1x128xf32> to vector<1x128xf32>
      %278 = vector.broadcast %277 : vector<1x128xf32> to vector<32x128xf32>
      %279 = arith.addf %274, %278 : vector<32x128xf32>
      %cst_121 = arith.constant 5.000000e-01 : f32
      %280 = vector.broadcast %cst_121 : f32 to vector<32x128xf32>
      %281 = arith.mulf %280, %279 : vector<32x128xf32>
      %cst_122 = arith.constant 4.471500e-02 : f32
      %282 = vector.broadcast %cst_122 : f32 to vector<32x128xf32>
      %283 = arith.mulf %282, %279 : vector<32x128xf32>
      %284 = arith.mulf %283, %279 : vector<32x128xf32>
      %285 = arith.mulf %284, %279 : vector<32x128xf32>
      %286 = arith.addf %279, %285 : vector<32x128xf32>
      %cst_123 = arith.constant 0.797884583 : f32
      %287 = vector.broadcast %cst_123 : f32 to vector<32x128xf32>
      %288 = arith.mulf %287, %286 : vector<32x128xf32>
      %289 = math.tanh %288 : vector<32x128xf32>
      %cst_124 = arith.constant 1.000000e+00 : f32
      %290 = vector.broadcast %cst_124 : f32 to vector<32x128xf32>
      %291 = arith.addf %290, %289 : vector<32x128xf32>
      %292 = arith.mulf %281, %291 : vector<32x128xf32>
      %293 = arith.truncf %292 : vector<32x128xf32> to vector<32x128xbf16>
      %294 = arith.index_cast %arg36 : i32 to index
      %c0_125 = arith.constant 0 : index
      %c0_126 = arith.constant 0 : index
      %295 = vector.load %arg32[%294, %c0_125, %c0_126] : memref<2x128x32xbf16, #tpu.memory_space<vmem>>, vector<1x128x32xbf16>
      %296 = vector.shape_cast %295 : vector<1x128x32xbf16> to vector<128x32xbf16>
      %cst_127 = arith.constant dense<0.000000e+00> : vector<32x32xf32>
      %297 = tpu.matmul %293, %296, %cst_127 {dimension_numbers = #tpu.dot_dimension_numbers<[1], [0], [0], [1], [0, 0, 1, 1], [], []>} : vector<32x128xbf16>, vector<128x32xbf16>, vector<32x32xf32> -> vector<32x32xf32>
      %298 = arith.index_cast %arg36 : i32 to index
      %c0_128 = arith.constant 0 : index
      %c0_129 = arith.constant 0 : index
      %299 = vector.load %arg33[%298, %c0_128, %c0_129] : memref<2x1x32xf32, #tpu.memory_space<vmem>>, vector<1x1x32xf32>
      %300 = vector.shape_cast %299 : vector<1x1x32xf32> to vector<1x32xf32>
      %301 = vector.broadcast %300 : vector<1x32xf32> to vector<32x32xf32>
      %302 = arith.addf %297, %301 : vector<32x32xf32>
      %303 = arith.addf %241, %302 : vector<32x32xf32>
      scf.yield %303 : vector<32x32xf32>
    }
    %c2_i32_5 = arith.constant 2 : i32
    %c0_6 = arith.constant 0 : index
    %c0_7 = arith.constant 0 : index
    %7 = vector.load %arg34[%c0_6, %c0_7] : memref<32x32xf32, #tpu.memory_space<vmem>>, vector<32x32xf32>
    tpu.vector_store %arg34[%c0_6, %c0_7], %6 {strides = array<i32>} : memref<32x32xf32, #tpu.memory_space<vmem>>, vector<32x32xf32>,
    return
  }
  func.func @transform_0(%arg0: i32) -> (i32, i32) {
    %c0_i32 = arith.constant 0 : i32
    %c0_i32_0 = arith.constant 0 : i32
    return %arg0, %c0_i32 : i32, i32
  }
  func.func @transform_1(%arg0: i32) -> (i32, i32) {
    %c0_i32 = arith.constant 0 : i32
    %c0_i32_0 = arith.constant 0 : i32
    return %arg0, %c0_i32 : i32, i32
  }
  func.func @transform_2(%arg0: i32) -> (i32, i32) {
    %c0_i32 = arith.constant 0 : i32
    %c0_i32_0 = arith.constant 0 : i32
    %c0_i32_1 = arith.constant 0 : i32
    return %c0_i32, %c0_i32_0 : i32, i32
  }
  func.func @transform_3(%arg0: i32) -> (i32, i32, i32) {
    %c0_i32 = arith.constant 0 : i32
    %c0_i32_0 = arith.constant 0 : i32
    %c0_i32_1 = arith.constant 0 : i32
    %c0_i32_2 = arith.constant 0 : i32
    return %c0_i32, %c0_i32_0, %c0_i32_1 : i32, i32, i32
  }
  func.func @transform_4(%arg0: i32) -> (i32, i32, i32) {
    %c0_i32 = arith.constant 0 : i32
    %c0_i32_0 = arith.constant 0 : i32
    %c0_i32_1 = arith.constant 0 : i32
    %c0_i32_2 = arith.constant 0 : i32
    return %c0_i32, %c0_i32_0, %c0_i32_1 : i32, i32, i32
  }
  func.func @transform_5(%arg0: i32) -> (i32, i32, i32) {
    %c0_i32 = arith.constant 0 : i32
    %c0_i32_0 = arith.constant 0 : i32
    %c0_i32_1 = arith.constant 0 : i32
    %c0_i32_2 = arith.constant 0 : i32
    return %c0_i32, %c0_i32_0, %c0_i32_1 : i32, i32, i32
  }
  func.func @transform_6(%arg0: i32) -> (i32, i32, i32) {
    %c0_i32 = arith.constant 0 : i32
    %c0_i32_0 = arith.constant 0 : i32
    %c0_i32_1 = arith.constant 0 : i32
    %c0_i32_2 = arith.constant 0 : i32
    return %c0_i32, %c0_i32_0, %c0_i32_1 : i32, i32, i32
  }
  func.func @transform_7(%arg0: i32) -> (i32, i32, i32) {
    %c0_i32 = arith.constant 0 : i32
    %c0_i32_0 = arith.constant 0 : i32
    %c0_i32_1 = arith.constant 0 : i32
    %c0_i32_2 = arith.constant 0 : i32
    return %c0_i32, %c0_i32_0, %c0_i32_1 : i32, i32, i32
  }
  func.func @transform_8(%arg0: i32) -> (i32, i32, i32) {
    %c0_i32 = arith.constant 0 : i32
    %c0_i32_0 = arith.constant 0 : i32
    %c0_i32_1 = arith.constant 0 : i32
    %c0_i32_2 = arith.constant 0 : i32
    return %c0_i32, %c0_i32_0, %c0_i32_1 : i32, i32, i32
  }
  func.func @transform_9(%arg0: i32) -> (i32, i32, i32) {
    %c0_i32 = arith.constant 0 : i32
    %c0_i32_0 = arith.constant 0 : i32
    %c0_i32_1 = arith.constant 0 : i32
    %c0_i32_2 = arith.constant 0 : i32
    return %c0_i32, %c0_i32_0, %c0_i32_1 : i32, i32, i32
  }
  func.func @transform_10(%arg0: i32) -> (i32, i32, i32) {
    %c0_i32 = arith.constant 0 : i32
    %c0_i32_0 = arith.constant 0 : i32
    %c0_i32_1 = arith.constant 0 : i32
    %c0_i32_2 = arith.constant 0 : i32
    return %c0_i32, %c0_i32_0, %c0_i32_1 : i32, i32, i32
  }
  func.func @transform_11(%arg0: i32) -> (i32, i32, i32) {
    %c0_i32 = arith.constant 0 : i32
    %c0_i32_0 = arith.constant 0 : i32
    %c0_i32_1 = arith.constant 0 : i32
    %c0_i32_2 = arith.constant 0 : i32
    return %c0_i32, %c0_i32_0, %c0_i32_1 : i32, i32, i32
  }
  func.func @transform_12(%arg0: i32) -> (i32, i32, i32) {
    %c0_i32 = arith.constant 0 : i32
    %c0_i32_0 = arith.constant 0 : i32
    %c0_i32_1 = arith.constant 0 : i32
    %c0_i32_2 = arith.constant 0 : i32
    return %c0_i32, %c0_i32_0, %c0_i32_1 : i32, i32, i32
  }
  func.func @transform_13(%arg0: i32) -> (i32, i32, i32) {
    %c0_i32 = arith.constant 0 : i32
    %c0_i32_0 = arith.constant 0 : i32
    %c0_i32_1 = arith.constant 0 : i32
    %c0_i32_2 = arith.constant 0 : i32
    return %c0_i32, %c0_i32_0, %c0_i32_1 : i32, i32, i32
  }
  func.func @transform_14(%arg0: i32) -> (i32, i32, i32) {
    %c0_i32 = arith.constant 0 : i32
    %c0_i32_0 = arith.constant 0 : i32
    %c0_i32_1 = arith.constant 0 : i32
    %c0_i32_2 = arith.constant 0 : i32
    return %c0_i32, %c0_i32_0, %c0_i32_1 : i32, i32, i32
  }
  func.func @transform_15(%arg0: i32) -> (i32, i32, i32) {
    %c0_i32 = arith.constant 0 : i32
    %c0_i32_0 = arith.constant 0 : i32
    %c0_i32_1 = arith.constant 0 : i32
    %c0_i32_2 = arith.constant 0 : i32
    return %c0_i32, %c0_i32_0, %c0_i32_1 : i32, i32, i32
  }
  func.func @transform_16(%arg0: i32) -> (i32, i32, i32) {
    %c0_i32 = arith.constant 0 : i32
    %c0_i32_0 = arith.constant 0 : i32
    %c0_i32_1 = arith.constant 0 : i32
    %c0_i32_2 = arith.constant 0 : i32
    return %c0_i32, %c0_i32_0, %c0_i32_1 : i32, i32, i32
  }
  func.func @transform_17(%arg0: i32) -> (i32, i32, i32) {
    %c0_i32 = arith.constant 0 : i32
    %c0_i32_0 = arith.constant 0 : i32
    %c0_i32_1 = arith.constant 0 : i32
    %c0_i32_2 = arith.constant 0 : i32
    return %c0_i32, %c0_i32_0, %c0_i32_1 : i32, i32, i32
  }
  func.func @transform_18(%arg0: i32) -> (i32, i32, i32) {
    %c0_i32 = arith.constant 0 : i32
    %c0_i32_0 = arith.constant 0 : i32
    %c0_i32_1 = arith.constant 0 : i32
    %c0_i32_2 = arith.constant 0 : i32
    return %c0_i32, %c0_i32_0, %c0_i32_1 : i32, i32, i32
  }
  func.func @transform_19(%arg0: i32) -> (i32, i32, i32) {
    %c0_i32 = arith.constant 0 : i32
    %c0_i32_0 = arith.constant 0 : i32
    %c0_i32_1 = arith.constant 0 : i32
    %c0_i32_2 = arith.constant 0 : i32
    return %c0_i32, %c0_i32_0, %c0_i32_1 : i32, i32, i32
  }
  func.func @transform_20(%arg0: i32) -> (i32, i32, i32) {
    %c0_i32 = arith.constant 0 : i32
    %c0_i32_0 = arith.constant 0 : i32
    %c0_i32_1 = arith.constant 0 : i32
    %c0_i32_2 = arith.constant 0 : i32
    return %c0_i32, %c0_i32_0, %c0_i32_1 : i32, i32, i32
  }
  func.func @transform_21(%arg0: i32) -> (i32, i32, i32) {
    %c0_i32 = arith.constant 0 : i32
    %c0_i32_0 = arith.constant 0 : i32
    %c0_i32_1 = arith.constant 0 : i32
    %c0_i32_2 = arith.constant 0 : i32
    return %c0_i32, %c0_i32_0, %c0_i32_1 : i32, i32, i32
  }
  func.func @transform_22(%arg0: i32) -> (i32, i32, i32) {
    %c0_i32 = arith.constant 0 : i32
    %c0_i32_0 = arith.constant 0 : i32
    %c0_i32_1 = arith.constant 0 : i32
    %c0_i32_2 = arith.constant 0 : i32
    return %c0_i32, %c0_i32_0, %c0_i32_1 : i32, i32, i32
  }
  func.func @transform_23(%arg0: i32) -> (i32, i32, i32) {
    %c0_i32 = arith.constant 0 : i32
    %c0_i32_0 = arith.constant 0 : i32
    %c0_i32_1 = arith.constant 0 : i32
    %c0_i32_2 = arith.constant 0 : i32
    return %c0_i32, %c0_i32_0, %c0_i32_1 : i32, i32, i32
  }
  func.func @transform_24(%arg0: i32) -> (i32, i32, i32) {
    %c0_i32 = arith.constant 0 : i32
    %c0_i32_0 = arith.constant 0 : i32
    %c0_i32_1 = arith.constant 0 : i32
    %c0_i32_2 = arith.constant 0 : i32
    return %c0_i32, %c0_i32_0, %c0_i32_1 : i32, i32, i32
  }
  func.func @transform_25(%arg0: i32) -> (i32, i32, i32) {
    %c0_i32 = arith.constant 0 : i32
    %c0_i32_0 = arith.constant 0 : i32
    %c0_i32_1 = arith.constant 0 : i32
    %c0_i32_2 = arith.constant 0 : i32
    return %c0_i32, %c0_i32_0, %c0_i32_1 : i32, i32, i32
  }
  func.func @transform_26(%arg0: i32) -> (i32, i32, i32) {
    %c0_i32 = arith.constant 0 : i32
    %c0_i32_0 = arith.constant 0 : i32
    %c0_i32_1 = arith.constant 0 : i32
    %c0_i32_2 = arith.constant 0 : i32
    return %c0_i32, %c0_i32_0, %c0_i32_1 : i32, i32, i32
  }
  func.func @transform_27(%arg0: i32) -> (i32, i32, i32) {
    %c0_i32 = arith.constant 0 : i32
    %c0_i32_0 = arith.constant 0 : i32
    %c0_i32_1 = arith.constant 0 : i32
    %c0_i32_2 = arith.constant 0 : i32
    return %c0_i32, %c0_i32_0, %c0_i32_1 : i32, i32, i32
  }
  func.func @transform_28(%arg0: i32) -> (i32, i32, i32) {
    %c0_i32 = arith.constant 0 : i32
    %c0_i32_0 = arith.constant 0 : i32
    %c0_i32_1 = arith.constant 0 : i32
    %c0_i32_2 = arith.constant 0 : i32
    return %c0_i32, %c0_i32_0, %c0_i32_1 : i32, i32, i32
  }
  func.func @transform_29(%arg0: i32) -> (i32, i32, i32) {
    %c0_i32 = arith.constant 0 : i32
    %c0_i32_0 = arith.constant 0 : i32
    %c0_i32_1 = arith.constant 0 : i32
    %c0_i32_2 = arith.constant 0 : i32
    return %c0_i32, %c0_i32_0, %c0_i32_1 : i32, i32, i32
  }
  func.func @transform_30(%arg0: i32) -> (i32, i32, i32) {
    %c0_i32 = arith.constant 0 : i32
    %c0_i32_0 = arith.constant 0 : i32
    %c0_i32_1 = arith.constant 0 : i32
    %c0_i32_2 = arith.constant 0 : i32
    return %c0_i32, %c0_i32_0, %c0_i32_1 : i32, i32, i32
  }
  func.func @transform_31(%arg0: i32) -> (i32, i32, i32) {
    %c0_i32 = arith.constant 0 : i32
    %c0_i32_0 = arith.constant 0 : i32
    %c0_i32_1 = arith.constant 0 : i32
    %c0_i32_2 = arith.constant 0 : i32
    return %c0_i32, %c0_i32_0, %c0_i32_1 : i32, i32, i32
  }
  func.func @transform_32(%arg0: i32) -> (i32, i32, i32) {
    %c0_i32 = arith.constant 0 : i32
    %c0_i32_0 = arith.constant 0 : i32
    %c0_i32_1 = arith.constant 0 : i32
    %c0_i32_2 = arith.constant 0 : i32
    return %c0_i32, %c0_i32_0, %c0_i32_1 : i32, i32, i32
  }
  func.func @transform_33(%arg0: i32) -> (i32, i32) {
    %c0_i32 = arith.constant 0 : i32
    %c0_i32_0 = arith.constant 0 : i32
    return %arg0, %c0_i32 : i32, i32
  }
}

</mosaic_0001>

<bundles_post_ra>
// kernel: tpu_custom_call.1
= control target key start
LH: loop header
LB: loop body
LE: loop exit
PB: predicated region body
PF: predicated region fallthrough
CT: control target
= control target key end

     0   :  { %s4788_s6 = smov 1   ;;  %s4789_s10 = smov 2   ;;  %s5495_s0 = inlined_call_operand.smem [shape: u32[34], index: -1, kind: input, shape index: {}] }
   0x1   :  { %s4834_s5 = sld [smem:[%s5495_s0]]   ;;  %s4790_s14 = smov 3  }
   0x2   :  { %s4839_s9 = sld [smem:[%s5495_s0 + %s4788_s6]]   ;;  %s4791_s18 = smov 4  }
   0x3   :  { %s4844_s13 = sld [smem:[%s5495_s0 + %s4789_s10]]   ;;  %s4792_s22 = smov 5  }
   0x4   :  { %s4849_s17 = sld [smem:[%s5495_s0 + %s4790_s14]]   ;;  %s4793_s26 = smov 6  }
   0x5   :  { %s4854_s21 = sld [smem:[%s5495_s0 + %s4791_s18]]   ;;  %s4794_s30 = smov 7  }
   0x6   :  { %s4859_s25 = sld [smem:[%s5495_s0 + %s4792_s22]]   ;;  %s4795_s4 = smov 8  }
   0x7   :  { %s4864_s29 = sld [smem:[%s5495_s0 + %s4793_s26]]   ;;  %s4796_s10 = smov 9  }
   0x8   :  { %s4869_s3 = sld [smem:[%s5495_s0 + %s4794_s30]]   ;;  %s4797_s15 = smov 10  }
   0x9   :  { %s4874_s8 = sld [smem:[%s5495_s0 + %s4795_s4]]   ;;  %s4798_s20 = smov 11  }
   0xa   :  { %s4879_s14 = sld [smem:[%s5495_s0 + %s4796_s10]]   ;;  %s4799_s26 = smov 12  }
   0xb   :  { %s4884_s19 = sld [smem:[%s5495_s0 + %s4797_s15]]   ;;  %s4800_s1 = smov 13  }
   0xc   :  { %s4889_s24 = sld [smem:[%s5495_s0 + %s4798_s20]]   ;;  %s4801_s7 = smov 14  }
   0xd   :  { %s4894_s30 = sld [smem:[%s5495_s0 + %s4799_s26]]   ;;  %s4802_s15 = smov 15  }
   0xe   :  { %s4899_s6 = sld [smem:[%s5495_s0 + %s4800_s1]]   ;;  %s4803_s22 = smov 16  }
   0xf   :  { %s4904_s12 = sld [smem:[%s5495_s0 + %s4801_s7]]   ;;  %s4804_s28 = smov 17  }
  0x10   :  { %s4909_s20 = sld [smem:[%s5495_s0 + %s4802_s15]]   ;;  %s4805_s7 = smov 18  }
  0x11   :  { %s4914_s27 = sld [smem:[%s5495_s0 + %s4803_s22]]   ;;  %s4806_s15 = smov 19  }
  0x12   :  { %5496 = sst [smem:[#allocation3_spill]] %s4889_s24  ;;  %s4807_s22 = smov 20  }
  0x13   :  { %5497 = sst [smem:[#allocation4_spill]] %s4894_s30 }
  0x14   :  { %5498 = sst [smem:[#allocation5_spill]] %s4899_s6 }
  0x15   :  { %5499 = sst [smem:[#allocation6_spill]] %s4904_s12 }
  0x16   :  { %5500 = sst [smem:[#allocation7_spill]] %s4909_s20 }
  0x17   :  { %5501 = sst [smem:[#allocation8_spill]] %s4914_s27 }
  0x18   :  { %s4919_s4 = sld [smem:[%s5495_s0 + %s4804_s28]]   ;;  %s4808_s28 = smov 21  }
  0x19   :  { %s4924_s30 = sld [smem:[%s5495_s0 + %s4805_s7]]   ;;  %s4809_s7 = smov 22  }
  0x1a   :  { %s4929_s12 = sld [smem:[%s5495_s0 + %s4806_s15]]   ;;  %s4810_s15 = smov 23  }
  0x1b   :  { %s4934_s27 = sld [smem:[%s5495_s0 + %s4807_s22]]   ;;  %s4811_s22 = smov 24  }
  0x1c   :  { %s4949_s20 = sld [smem:[%s5495_s0 + %s4810_s15]]   ;;  %s4814_s15 = smov 27  }
  0x1d   :  { %s4954_s24 = sld [smem:[%s5495_s0 + %s4811_s22]]   ;;  %s4815_s22 = smov 28  }
  0x1e   :  { %5502 = sst [smem:[#allocation9_spill]] %s4919_s4 }
  0x1f   :  { %5503 = sst [smem:[#allocation10_spill]] %s4924_s30 }
  0x20   :  { %s4939_s4 = sld [smem:[%s5495_s0 + %s4808_s28]]   ;;  %s4812_s28 = smov 25  }
  0x21   :  { %s4944_s30 = sld [smem:[%s5495_s0 + %s4809_s7]]   ;;  %s4813_s7 = smov 26  }
  0x22   :  { %5506 = sst [smem:[#allocation13_spill]] %s4949_s20 }
  0x23   :  { %5507 = sst [smem:[#allocation14_spill]] %s4954_s24 }
  0x24   :  { %s4969_s20 = sld [smem:[%s5495_s0 + %s4814_s15]]   ;;  %s4818_s15 = smov 31  }
  0x25   :  { %s4974_s24 = sld [smem:[%s5495_s0 + %s4815_s22]]   ;;  %s4819_s22 = smov 32  }
  0x26   :  { %5504 = sst [smem:[#allocation11_spill]] %s4939_s4 }
  0x27   :  { %5505 = sst [smem:[#allocation12_spill]] %s4944_s30 }
  0x28   :  { %s4959_s4 = sld [smem:[%s5495_s0 + %s4812_s28]]   ;;  %s4816_s28 = smov 29  }
  0x29   :  { %s4964_s30 = sld [smem:[%s5495_s0 + %s4813_s7]]   ;;  %s4817_s7 = smov 30  }
  0x2a   :  { %5509 = sst [smem:[#allocation16_spill]] %s4969_s20 }
  0x2b   :  { %5510 = sst [smem:[#allocation17_spill]] %s4974_s24 }
  0x2c   :  { %s4979_s6 = sld [smem:[%s5495_s0 + %s4816_s28]]   ;;  %s4820_s28 = smov 33  }
  0x2d   :  { %s4989_s20 = sld [smem:[%s5495_s0 + %s4818_s15]]  }
  0x2e   :  { %s4994_s24 = sld [smem:[%s5495_s0 + %s4819_s22]]  }
  0x2f   :  { %5508 = sst [smem:[#allocation15_spill]] %s4964_s30 }
  0x30   :  { %s4984_s30 = sld [smem:[%s5495_s0 + %s4817_s7]]   ;;  %s5001_s7 = smov 0  }
  0x32   :  { %5511 = sst [smem:[#allocation18_spill]] %s4979_s6 }
  0x33   :  { %s4999_s6 = sld [smem:[%s5495_s0 + %s4820_s28]]  }
  0x34 LB: > { %s3976_s10 = sadd.s32 4294967295, %s4766_s7   ;;  %p3980_p0 = scmp.ge.s32.totalorder %s4766_s7, 1  ;;  %s4766_s7 = sphi %s5001_s7, %s77_s7  }
  0x35   : > { %p933_p1 = scmp.lt.s32.totalorder %s4766_s7, 3 }
  0x37   : > { %p934_p2 = pnand %p3980_p0, %p933_p1 }
  0x38   : > { %s3981_s11 = sshll.u32 (!%p934_p2), %s3976_s10, 2  ;;  %s3983_s0 = sshll.u32 (!%p934_p2), %s3976_s10, 3  ;;  %v5010_v0 = vld [vmem:[%s4844_s13] sm:$0xff] (!%p934_p2) }
  0x39   : > { %937 = sbr.rel (%p934_p2) target bundleno = 4664 (0x1238), region = 152  ;;  %p1023_p3 = scmp.lt.s32.totalorder (!%p934_p2), %s3981_s11, 7  ;;  %v5013_v1 = vmul.f32 (!%p934_p2), -1000000.0, %v5010_v0 }
  0x3a   : > { %p1029_p4 = scmp.lt.s32.totalorder (!%p934_p2), %s3983_s0, 15  ;;  %s5044_s26 = smov (!%p934_p2), 0  }
  0x40   : > { %s5533_s11 = smov (!%p1023_p3, %s3981_s11), 7  ;;  %s5535_s0 = smov (!%p1029_p4, %s3983_s0), 15 }
  0x41   : > { %s3982_s15 = sshll.u32 %s5533_s11, 3  ;;  %s3984_s18 = sshll.u32 %s5535_s0, 3 }
  0x42   : > { %s1026_s16 = scalar_lea.vmem %s4834_s5, %s3982_s15  ;;  %s1032_s22 = scalar_lea.vmem %s4839_s9, %s3984_s18 }
  0x43   : > { %s5018_s23 = scalar_lea.vmem %s4999_s6, %s3982_s15  ;;  %v1041_v2 = vld [vmem:[%s1026_s16] sm:$0xff]   ;;  %v1042_v3 = vld [vmem:[%s1026_s16 + $0x8] sm:$0xff]   ;;  %v1043_v4 = vld [vmem:[%s1026_s16 + $0x10] sm:$0xff]  }
  0x44   : > { %v1044_v5 = vld [vmem:[%s1026_s16 + $0x18] sm:$0xff]   ;;  %v5020_v6 = vld [vmem:[%s1032_s22] sm:$0xff]  ;;  %v5022_v7 = vld [vmem:[%s1032_s22 + $0x8] sm:$0xff] }
  0x45   : > { %v5024_v8 = vld [vmem:[%s1032_s22 + $0x10] sm:$0xff]  ;;  %v5026_v9 = vld [vmem:[%s1032_s22 + $0x18] sm:$0xff]  ;;  %v5028_v10 = vld [vmem:[%s1032_s22 + $0x20] sm:$0xff] }
  0x46   : > { %v5030_v11 = vld [vmem:[%s1032_s22 + $0x28] sm:$0xff]  ;;  %v5032_v12 = vld [vmem:[%s1032_s22 + $0x30] sm:$0xff]  ;;  %v5034_v13 = vld [vmem:[%s1032_s22 + $0x38] sm:$0xff] }
  0x47 LB: >> { %vm1094_vm0 = vcmask 261120   ;;  %s5062_s28 = sshll.u32 %s4786_s26, 4  ;;  %v1065_v14 = vpack.c.bf16 %v4778_v3, %v4782_v2  ;;  %v1066_v20 = vpack.c.bf16 %v4770_v5, %v4774_v4  ;;  %v4821_v22 = vmov 0.0   ;;  %s1172_s11 = scalar_lea.vmem %s4864_s29, %s4786_s26  ;;  %s4786_s26 = sphi %s5044_s26, %s1060_s26   ;;  %v4782_v2 = vphi %v1041_v2, %v5531_v2   ;;  %v4778_v3 = vphi %v1042_v3, %v5530_v3   ;;  %v4774_v4 = vphi %v1043_v4, %v5529_v4   ;;  %v4770_v5 = vphi %v1044_v5, %v5528_v5  }
  0x48   : >> { %s1167_s1 = scalar_lea.vmem %s4859_s25, %s5062_s28  ;;  %s1069_s2 = scalar_lea.vmem %s4849_s17, %s5062_s28  ;;  %vm4822_vm1 = vmmov 0   ;;  %v3999_v23 = vld [vmem:[%s1172_s11] ss:$0 sm:$0xff]  ;;  %vm1528_vm2 = vcmask 64512   ;;  %vm1976_vm3 = vcmask 130048   ;;  %vm1981_vm4 = vcmask 195584  }
  0x49   : >> { %v4632_v15 = vld [vmem:[%s1167_s1] sm:$0xff]   ;;  %4265 = vmatprep.mubr.msk.bf16.mxu1 %vm1094_vm0, %v1065_v14  ;;  %4257 = vmatprep.mubr.msk.bf16.mxu0 %vm1094_vm0, %v1065_v14  ;;  %v4634_v17 = vld [vmem:[%s1167_s1 + $0x8] sm:$0xff]   ;;  %s1254_s10 = scalar_lea.vmem %s4869_s3, %s5062_s28  ;;  %s1074_s0 = scalar_lea.vmem %s4854_s21, %s4786_s26 }
  0x4a   : >> { %v4633_v16 = vld [vmem:[%s1069_s2] sm:$0xff]   ;;  %4261 = vmatprep.subr.bf16.mxu1 %v4632_v15  ;;  %v4635_v18 = vld [vmem:[%s1069_s2 + $0x8] sm:$0xff]   ;;  %s1259_s15 = scalar_lea.vmem %s4874_s8, %s4786_s26  ;;  %s1989_s16 = scalar_lea.vmem %s4879_s14, %s5062_s28 }
  0x4b   : >> { %4262 = vmatpush3.bf16.msra.mxu1 %v4632_v15  ;;  %4253 = vmatprep.subr.bf16.mxu0 %v4633_v16  ;;  %v4636_v19 = vld [vmem:[%s1254_s10] sm:$0xff]   ;;  %v4637_v21 = vld [vmem:[%s1254_s10 + $0x8] sm:$0xff]   ;;  %s4823_s18 = smov 16   ;;  %s4824_s22 = smov 8  }
  0x4c   : >> { %4254 = vmatpush3.bf16.msra.mxu0 %v4633_v16  ;;  %4263 = vmatprep.subr.bf16.mxu1 %v4634_v17  ;;  %v3989_v25 = vld [vmem:[%s1074_s0] ss:$0 sm:$0xff]  ;;  %s4825_s1 = smov 24   ;;  %s1994_s2 = scalar_lea.vmem %s4884_s19, %s4786_s26 }
  0x4d   : >> { %4255 = vmatprep.subr.bf16.mxu0 %v4635_v18  ;;  %s2153_s10 = scalar_lea.vmem %s4959_s4, %s5062_s28  ;;  %s2073_s11 = scalar_lea.vmem %s4929_s12, %s4786_s26 }
  0x4e   : >> { %s2075_s0 = scalar_lea.vmem %s4934_s27, %s4786_s26 }
  0x4f   : >> { %4264 = vmatpush3.bf16.msra.mxu1 %v4634_v17 }
  0x50   : >> { %4256 = vmatpush3.bf16.msra.mxu0 %v4635_v18  ;;  %4277 = vmatprep.subr.bf16.mxu1 %v4821_v22 }
  0x51   : >> { %4269 = vmatprep.subr.bf16.mxu0 %v4636_v19 }
  0x52   : >> { %4266 = vmatmul.mubr.msk.bf16.vlgmr.msra.gmra.mrb[0].mxu1 %vm1094_vm0, %v1066_v20 }
  0x53   : >> { %4258 = vmatmul.mubr.msk.bf16.vlgmr.msra.gmra.mrb[0].mxu0 %vm1094_vm0, %v1066_v20  ;;  %4279 = vmatprep.mubr.msk.bf16.mxu1 %vm4822_vm1, %v4821_v22 }
  0x54   : >> { %4270 = vmatpush3.bf16.msra.mxu0 %v4636_v19  ;;  %4273 = vmatprep.mubr.msk.bf16.mxu0 %vm1094_vm0, %v1065_v14 }
  0x55   : >> { %4271 = vmatprep.subr.bf16.mxu0 %v4637_v21 }
  0x58   : >> { %4272 = vmatpush3.bf16.msra.mxu0 %v4637_v21 }
  0x59   : >> { %4283 = vmatprep.subr.bf16.mxu0 %v4821_v22 }
  0x5b   : >> { %4274 = vmatmul.mubr.msk.bf16.vlgmr.msra.gmra.mrb[4].mxu0 %vm1094_vm0, %v1066_v20 }
  0x5c   : >> { %4285 = vmatprep.mubr.msk.bf16.mxu0 %vm4822_vm1, %v4821_v22 }
 0x125   : >> { %v4267_v24 = vpop.f32.mrb[0].mxu1 }
 0x126   : >> { %v1226_v26 = vpop.f32.mrb[1].mxu1  ;;  %v4259_v27 = vpop.f32.mrb[0].mxu0  ;;  %v1235_v37 = vadd.f32 %v4267_v24, %v3999_v23 }
 0x127   : >> { %v1227_v28 = vadd.f32 %v3999_v23, %v1226_v26  ;;  %v4268_v29 = vpop.f32.mrb[2].mxu1  ;;  %v1135_v30 = vpop.f32.mrb[1].mxu0  ;;  %v1144_v51 = vadd.f32 %v4259_v27, %v3989_v25 }
 0x128   : >> { %v1229_v31 = vpop.f32.mrb[3].mxu1  ;;  %v1136_v32 = vadd.f32 %v3989_v25, %v1135_v30  ;;  %v4260_v33 = vpop.f32.mrb[2].mxu0  ;;  %v1238_v42 = vadd.f32 %v4268_v29, %v3999_v23  ;;  %v4129_v45 = vpack.c.bf16 %v1235_v37, %v1235_v37 }
 0x129   : >> { %v4127_v34 = vpack.c.bf16 %v1227_v28, %v1227_v28  ;;  %v1230_v35 = vadd.f32 %v3999_v23, %v1229_v31  ;;  %v1138_v36 = vpop.f32.mrb[3].mxu0  ;;  %v1147_v54 = vadd.f32 %v4260_v33, %v3989_v25  ;;  %v1152_v57 = vmul.f32 0.35355338, %v1144_v51 }
 0x12a   : >> { %v1150_v40 = vmul.f32 0.35355338, %v1136_v32  ;;  %v1139_v41 = vadd.f32 %v3989_v25, %v1138_v36  ;;  %v4130_v50 = vpack.c.bf16 %v1238_v42, %v1238_v42  ;;  %v1440_v53 = vsel %vm1094_vm0, %v4129_v45, 0 }
 0x12b   : >> { %v1348_v38 = vsel %vm1094_vm0, %v4127_v34, 0  ;;  %v4128_v39 = vpack.c.bf16 %v1230_v35, %v1230_v35  ;;  %v1153_v58 = vmul.f32 0.35355338, %v1147_v54  ;;  %v4124_v59 = vpack.c.bf16 %v1152_v57, %v1152_v57 }
 0x12c   : >> { %4278 = vmatpush3.bf16.xpose.msra.mxu1 %v1348_v38  ;;  %v4122_v46 = vpack.c.bf16 %v1150_v40, %v1150_v40  ;;  %v1151_v47 = vmul.f32 0.35355338, %v1139_v41  ;;  %v1486_v56 = vsel %vm1094_vm0, %v4130_v50, 0 }
 0x12d   : >> { %v1394_v43 = vsel %vm1094_vm0, %v4128_v39, 0  ;;  %4289 = vmatprep.subr.bf16.mxu1 %v4821_v22  ;;  %v4125_v60 = vpack.c.bf16 %v1153_v58, %v1153_v58 }
 0x12e   : >> { %4284 = vmatpush3.bf16.xpose.msra.mxu0 %v1394_v43  ;;  %v5093_v44 = vpop.f32.mrb[4].mxu0  ;;  %v4123_v55 = vpack.c.bf16 %v1151_v47, %v1151_v47 }
 0x12f   : >> { %4295 = vmatprep.subr.bf16.mxu0 %v4821_v22  ;;  %v5096_v48 = vpop.f32.mrb[5].mxu0 }
 0x130   : >> { %v5098_v49 = vpop.f32.mrb[6].mxu0 }
 0x131   : >> { %v5100_v52 = vpop.f32.mrb[7].mxu0 }
 0x133   : >> { %4280 = vmatmul.mubr.msk.bf16.vlgmr.msra.gmra.mrb[4].mxu1 %vm1094_vm0, %v4122_v46 }
 0x134   : >> { %4290 = vmatpush3.bf16.xpose.msra.mxu1 %v1440_v53  ;;  %4291 = vmatprep.mubr.msk.bf16.mxu1 %vm4822_vm1, %v4821_v22 }
 0x135   : >> { %4286 = vmatmul.mubr.msk.bf16.vlgmr.msra.gmra.mrb[8].mxu0 %vm1094_vm0, %v4123_v55 }
 0x136   : >> { %4296 = vmatpush3.bf16.xpose.msra.mxu0 %v1486_v56  ;;  %4297 = vmatprep.mubr.msk.bf16.mxu0 %vm4822_vm1, %v4821_v22 }
 0x13b   : >> { %4292 = vmatmul.mubr.msk.bf16.vlgmr.msra.gmra.mrb[8].mxu1 %vm1094_vm0, %v4124_v59 }
 0x13d   : >> { %4298 = vmatmul.mubr.msk.bf16.vlgmr.msra.gmra.mrb[12].mxu0 %vm1094_vm0, %v4125_v60  ;;  %v4009_v60 = vld [vmem:[%s1259_s15] ss:$0 sm:$0xff]  ;;  %s5512_s15 = sld [smem:[#allocation16_spill]] }
 0x206   : >> { %v1384_v61 = vpop.f32.mrb[4].mxu1 }
 0x207   : >> { %v1385_v62 = vadd.f32 %v1384_v61, %v5013_v1  ;;  %v4281_v63 = vpop.f32.mrb[5].mxu1  ;;  %v1314_v61 = vadd.f32 %v4009_v60, %v5096_v48 }
 0x208   : >> { %v1387_v14 = vpop.f32.mrb[6].mxu1  ;;  %v1430_v15 = vpop.f32.mrb[8].mxu0  ;;  %v1317_v63 = vadd.f32 %v4009_v60, %v5100_v52 }
 0x209   : >> { %v1431_v16 = vadd.f32 %v1430_v15, %v5013_v1  ;;  %v4282_v17 = vpop.f32.mrb[7].mxu1  ;;  %v4287_v18 = vpop.f32.mrb[9].mxu0  ;;  %v1529_v19 = vsel %vm1528_vm2, %v1385_v62, -inf  ;;  %v1322_v14 = vadd.f32 %v5093_v44, %v4009_v60 }
 0x20a   : >> { %v1433_v20 = vpop.f32.mrb[10].mxu0  ;;  %1530 = vmax.xlane.f32.xlu0 %v1529_v19  ;;  %v4133_v15 = vpack.c.bf16 %v1317_v63, %v1317_v63  ;;  %v1325_v17 = vadd.f32 %v5098_v49, %v4009_v60 }
 0x20b   : >> { %v4288_v21 = vpop.f32.mrb[11].mxu0  ;;  %v1532_v23 = vsel %vm1528_vm2, %v1431_v16, -inf }
 0x20c   : >> { %v4135_v18 = vpack.c.bf16 %v1325_v17, %v1325_v17 }
 0x20e   : >> { %1533 = vmax.xlane.f32.xlu0 %v1532_v23  ;;  %v1476_v24 = vpop.f32.mrb[8].mxu1 }
 0x20f   : >> { %v1477_v25 = vadd.f32 %v1476_v24, %v5013_v1  ;;  %v4293_v26 = vpop.f32.mrb[9].mxu1 }
 0x210   : >> { %v1479_v27 = vpop.f32.mrb[10].mxu1  ;;  %v1522_v28 = vpop.f32.mrb[12].mxu0 }
 0x211   : >> { %v1523_v29 = vadd.f32 %v1522_v28, %v5013_v1  ;;  %v4294_v30 = vpop.f32.mrb[11].mxu1  ;;  %v4299_v31 = vpop.f32.mrb[13].mxu0  ;;  %v1535_v32 = vsel %vm1528_vm2, %v1477_v25, -inf }
 0x212   : >> { %v1525_v33 = vpop.f32.mrb[14].mxu0  ;;  %1536 = vmax.xlane.f32.xlu1 %v1535_v32 }
 0x213   : >> { %v4300_v34 = vpop.f32.mrb[15].mxu0  ;;  %v1538_v35 = vsel %vm1528_vm2, %v1523_v29, -inf }
 0x216   : >> { %1539 = vmax.xlane.f32.xlu1 %v1538_v35 }
 0x297   : >> { %v1531_v36 = vpop.xlane.xlu0 %1530 }
 0x298   : >> { %v1541_v37 = vsub.f32 %v1385_v62, %v1531_v36  ;;  %v4132_v62 = vpack.c.bf16 %v1314_v61, %v1314_v61 }
 0x29a   : >> { %v1545_v38 = vmul.f32 1.442695, %v1541_v37 }
 0x29b   : >> { %v1534_v39 = vpop.xlane.xlu0 %1533 }
 0x29c   : >> { %4668 = vpow2.f32 %v1545_v38  ;;  %v1542_v40 = vsub.f32 %v1431_v16, %v1534_v39  ;;  %v4134_v16 = vpack.c.bf16 %v1322_v14, %v1322_v14 }
 0x29e   : >> { %v1547_v41 = vmul.f32 1.442695, %v1542_v40 }
 0x29f   : >> { %v1537_v42 = vpop.xlane.xlu1 %1536 }
 0x2a0   : >> { %4670 = vpow2.f32 %v1547_v41  ;;  %v1543_v43 = vsub.f32 %v1477_v25, %v1537_v42 }
 0x2a2   : >> { %v1549_v45 = vmul.f32 1.442695, %v1543_v43 }
 0x2a3   : >> { %v1540_v46 = vpop.xlane.xlu1 %1539 }
 0x2a4   : >> { %4672 = vpow2.f32 %v1549_v45  ;;  %v1544_v47 = vsub.f32 %v1523_v29, %v1540_v46 }
 0x2a6   : >> { %v4669_v50 = vpop.eup %4668  ;;  %v1551_v51 = vmul.f32 1.442695, %v1544_v47 }
 0x2a7   : >> { %v1553_v53 = vsel %vm1528_vm2, %v4669_v50, 0.0 }
 0x2a8   : >> { %4674 = vpow2.f32 %v1551_v51  ;;  %1554 = vadd.xlane.f32.xlu0 %v1553_v53 }
 0x2aa   : >> { %v4671_v54 = vpop.eup %4670 }
 0x2ab   : >> { %v1556_v55 = vsel %vm1528_vm2, %v4671_v54, 0.0 }
 0x2ac   : >> { %1557 = vadd.xlane.f32.xlu1 %v1556_v55 }
 0x2ae   : >> { %v4673_v56 = vpop.eup %4672 }
 0x2af   : >> { %v1559_v57 = vsel %vm1528_vm2, %v4673_v56, 0.0 }
 0x2b0   : >> { %1560 = vadd.xlane.f32.xlu0 %v1559_v57 }
 0x2b2   : >> { %v4675_v58 = vpop.eup %4674 }
 0x2b3   : >> { %v1562_v59 = vsel %vm1528_vm2, %v4675_v58, 0.0 }
 0x2b4   : >> { %1563 = vadd.xlane.f32.xlu1 %v1562_v59 }
 0x2dd   : >> { %1581 = vxpose.xlu0.c.b16.start.end [1/1] (short) (narrow) %v4132_v62, 32 }
 0x2e1   : >> { %1655 = vxpose.xlu1.c.b16.start.end [1/1] (short) (narrow) %v4133_v15, 32 }
 0x2e2   : >> { %1729 = vxpose.xlu0.c.b16.start.end [1/1] (short) (narrow) %v4134_v16, 32 }
 0x2e6   : >> { %1803 = vxpose.xlu1.c.b16.start.end [1/1] (short) (narrow) %v4135_v18, 32 }
 0x335   : >> { %v1555_v19 = vpop.xlane.xlu0 %1554 }
 0x336   : >> { %4676 = vrcp.f32 %v1555_v19 }
 0x339   : >> { %v1558_v20 = vpop.xlane.xlu1 %1557 }
 0x33a   : >> { %4678 = vrcp.f32 %v1558_v20 }
 0x33d   : >> { %v1561_v21 = vpop.xlane.xlu0 %1560 }
 0x33e   : >> { %4680 = vrcp.f32 %v1561_v21 }
 0x340   : >> { %v4677_v48 = vpop.eup %4676 }
 0x341   : >> { %v1564_v23 = vpop.xlane.xlu1 %1563  ;;  %v1569_v52 = vmul.f32 %v4677_v48, %v4669_v50 }
 0x342   : >> { %4682 = vrcp.f32 %v1564_v23 }
 0x343   : >> { %v1573_v44 = vmul.f32 %v1569_v52, %v5010_v0  ;;  %v1589_v24 = vpop.trf.xlu0 }
 0x344   : >> { %v4679_v25 = vpop.eup %4678  ;;  %4303 = vmatprep.mubr.msk.bf16.mxu1 %vm1528_vm2, %v1589_v24 }
 0x345   : >> { %v1577_v49 = vpack.c.bf16 %v1573_v44, %v1573_v44  ;;  %v1570_v26 = vmul.f32 %v4679_v25, %v4671_v54  ;;  %v4638_v44 = vld [vmem:[%s1989_s16] sm:$0xff]  }
 0x347   : >> { %4477 = vmatprep.subr.msk.bf16.mxu1 %vm1528_vm2, %v1577_v49  ;;  %v1604_v27 = vsel %vm1528_vm2, %v1577_v49, 0  ;;  %v1574_v28 = vmul.f32 %v1570_v26, %v5010_v0  ;;  %v1663_v29 = vpop.trf.xlu1  ;;  %v1590_v31 = vpop.trf.xlu0  ;;  %v4639_v49 = vld [vmem:[%s1989_s16 + $0x8] sm:$0xff]   ;;  %s4138_s16 = sshll.u32 %s4786_s26, 6 }
 0x348   : >> { %v4681_v30 = vpop.eup %4680  ;;  %4302 = vmatpush3.bf16.xpose.msra.mxu1 %v1604_v27  ;;  %4309 = vmatprep.mubr.msk.bf16.mxu0 %vm1528_vm2, %v1663_v29 }
 0x349   : >> { %v1578_v32 = vpack.c.bf16 %v1574_v28, %v1574_v28  ;;  %v1571_v33 = vmul.f32 %v4681_v30, %v4673_v56 }
 0x34b   : >> { %4478 = vmatprep.subr.msk.bf16.mxu0 %vm1528_vm2, %v1578_v32  ;;  %v1678_v34 = vsel %vm1528_vm2, %v1578_v32, 0  ;;  %v1575_v35 = vmul.f32 %v1571_v33, %v5010_v0  ;;  %v1664_v36 = vpop.trf.xlu1  ;;  %v1737_v40 = vpop.trf.xlu0 }
 0x34c   : >> { %v4683_v37 = vpop.eup %4682  ;;  %4308 = vmatpush3.bf16.xpose.msra.mxu0 %v1678_v34 }
 0x34d   : >> { %v1579_v38 = vpack.c.bf16 %v1575_v35, %v1575_v35  ;;  %v1572_v39 = vmul.f32 %v4683_v37, %v4675_v58 }
 0x34f   : >> { %4479 = vmatprep.subr.msk.bf16.mxu1 %vm1528_vm2, %v1579_v38  ;;  %4304 = vmatmul.mubr.msk.bf16.vlgmr.msra.gmra.mrb[12].mxu1 %vm1528_vm2, %v1590_v31  ;;  %v1752_v41 = vsel %vm1528_vm2, %v1579_v38, 0  ;;  %v1576_v42 = vmul.f32 %v1572_v39, %v5010_v0  ;;  %v1811_v45 = vpop.trf.xlu1  ;;  %v1738_v47 = vpop.trf.xlu0 }
 0x350   : >> { %4314 = vmatpush3.bf16.xpose.msra.mxu1 %v1752_v41  ;;  %4315 = vmatprep.mubr.msk.bf16.mxu1 %vm1528_vm2, %v1737_v40 }
 0x351   : >> { %v1580_v43 = vpack.c.bf16 %v1576_v42, %v1576_v42  ;;  %4325 = vmatprep.subr.bf16.mxu1 %v4638_v44 }
 0x353   : >> { %4310 = vmatmul.mubr.msk.bf16.vlgmr.msra.gmra.mrb[16].mxu0 %vm1528_vm2, %v1664_v36  ;;  %4480 = vmatprep.subr.msk.bf16.mxu0 %vm1528_vm2, %v1580_v43  ;;  %v1826_v46 = vsel %vm1528_vm2, %v1580_v43, 0  ;;  %v1812_v50 = vpop.trf.xlu1 }
 0x354   : >> { %4320 = vmatpush3.bf16.xpose.msra.mxu0 %v1826_v46  ;;  %4321 = vmatprep.mubr.msk.bf16.mxu0 %vm1528_vm2, %v1811_v45 }
 0x357   : >> { %4316 = vmatmul.mubr.msk.bf16.vlgmr.msra.gmra.mrb[16].mxu1 %vm1528_vm2, %v1738_v47 }
 0x358   : >> { %4326 = vmatpush3.bf16.msra.mxu1 %v4638_v44  ;;  %v4031_v44 = vld [vmem:[%s1994_s2] ss:$0 sm:$0xff]  ;;  %s2273_s2 = scalar_lea.vmem %s5512_s15, %s4138_s16 }
 0x359   : >> { %4327 = vmatprep.subr.bf16.mxu1 %v4639_v49 }
 0x35b   : >> { %4322 = vmatmul.mubr.msk.bf16.vlgmr.msra.gmra.mrb[20].mxu0 %vm1528_vm2, %v1812_v50 }
 0x35c   : >> { %4328 = vmatpush3.bf16.msra.mxu1 %v4639_v49 }
 0x422   : >> { %v4305_v51 = vpop.f32.mrb[12].mxu1 }
 0x423   : >> { %1879 = vst.msk [vmem:[#allocation2 + $0x10] sm:$0xff] %vm1528_vm2, %v4305_v51  ;;  %v1640_v53 = vpop.f32.mrb[13].mxu1 }
 0x424   : >> { %1877 = vst.msk [vmem:[#allocation2] sm:$0xff] %vm1528_vm2, %v1640_v53  ;;  %v4306_v54 = vpop.f32.mrb[14].mxu1 }
 0x425   : >> { %1880 = vst.msk [vmem:[#allocation2 + $0x18] sm:$0xff] %vm1528_vm2, %v4306_v54  ;;  %v1643_v55 = vpop.f32.mrb[15].mxu1 }
 0x426   : >> { %1878 = vst.msk [vmem:[#allocation2 + $0x8] sm:$0xff] %vm1528_vm2, %v1643_v55  ;;  %v4311_v56 = vpop.f32.mrb[16].mxu0 }
 0x427   : >> { %1883 = vst.msk [vmem:[#allocation2 + $0x30] sm:$0xff] %vm1528_vm2, %v4311_v56  ;;  %v1714_v57 = vpop.f32.mrb[17].mxu0 }
 0x428   : >> { %1881 = vst.msk [vmem:[#allocation2 + $0x20] sm:$0xff] %vm1528_vm2, %v1714_v57  ;;  %v4312_v58 = vpop.f32.mrb[18].mxu0 }
 0x429   : >> { %1884 = vst.msk [vmem:[#allocation2 + $0x38] sm:$0xff] %vm1528_vm2, %v4312_v58  ;;  %v1717_v59 = vpop.f32.mrb[19].mxu0 }
 0x42a   : >> { %1882 = vst.msk [vmem:[#allocation2 + $0x28] sm:$0xff] %vm1528_vm2, %v1717_v59  ;;  %v4317_v60 = vpop.f32.mrb[16].mxu1 }
 0x42b   : >> { %1887 = vst.msk [vmem:[#allocation2 + $0x50] sm:$0xff] %vm1528_vm2, %v4317_v60  ;;  %v1788_v61 = vpop.f32.mrb[17].mxu1 }
 0x42c   : >> { %1885 = vst.msk [vmem:[#allocation2 + $0x40] sm:$0xff] %vm1528_vm2, %v1788_v61  ;;  %v4318_v62 = vpop.f32.mrb[18].mxu1 }
 0x42d   : >> { %1888 = vst.msk [vmem:[#allocation2 + $0x58] sm:$0xff] %vm1528_vm2, %v4318_v62  ;;  %v1791_v63 = vpop.f32.mrb[19].mxu1  ;;  %v1909_v17 = vld [vmem:[#allocation2 + $0x2] ss:$4 sm:$0xff]  ;;  %v1901_v18 = vld [vmem:[#allocation2 + $0x1] ss:$4 sm:$0xff] }
 0x42e   : >> { %1886 = vst.msk [vmem:[#allocation2 + $0x48] sm:$0xff] %vm1528_vm2, %v1791_v63  ;;  %v4323_v14 = vpop.f32.mrb[20].mxu0  ;;  %v1917_v24 = vld [vmem:[#allocation2 + $0x3] ss:$4 sm:$0xff]  ;;  %v1893_v42 = vld [vmem:[#allocation2] ss:$4 sm:$0xff] }
 0x42f   : >> { %1891 = vst.msk [vmem:[#allocation2 + $0x70] sm:$0xff] %vm1528_vm2, %v4323_v14  ;;  %v1862_v15 = vpop.f32.mrb[21].mxu0 }
 0x430   : >> { %1889 = vst.msk [vmem:[#allocation2 + $0x60] sm:$0xff] %vm1528_vm2, %v1862_v15  ;;  %v4324_v16 = vpop.f32.mrb[22].mxu0 }
 0x431   : >> { %1892 = vst.msk [vmem:[#allocation2 + $0x78] sm:$0xff] %vm1528_vm2, %v4324_v16  ;;  %v1865_v19 = vpop.f32.mrb[23].mxu0  ;;  %v1911_v20 = vld [vmem:[#allocation2 + $0x22] ss:$4 sm:$0xff]  ;;  %v1903_v21 = vld [vmem:[#allocation2 + $0x21] ss:$4 sm:$0xff] }
 0x432   : >> { %1890 = vst.msk [vmem:[#allocation2 + $0x68] sm:$0xff] %vm1528_vm2, %v1865_v19  ;;  %v4577_v48 = vpack.i.bf16 %v1911_v20, %v1909_v17  ;;  %v4572_v23 = vpack.i.bf16 %v1903_v21, %v1901_v18  ;;  %v1919_v52 = vld [vmem:[#allocation2 + $0x23] ss:$4 sm:$0xff]  ;;  %v1895_v41 = vld [vmem:[#allocation2 + $0x20] ss:$4 sm:$0xff] }
 0x433   : >> { %v4582_v25 = vpack.i.bf16 %v1919_v52, %v1917_v24 }
 0x434   : >> { %4578 = vrot.lane.b32.xlu1 %v4577_v48, %s4823_s18  ;;  %4573 = vrot.lane.b32.xlu0 %v4572_v23, %s4824_s22 }
 0x435   : >> { %v1905_v26 = vld [vmem:[#allocation2 + $0x41] ss:$4 sm:$0xff]  ;;  %v1913_v30 = vld [vmem:[#allocation2 + $0x42] ss:$4 sm:$0xff]  ;;  %v1921_v33 = vld [vmem:[#allocation2 + $0x43] ss:$4 sm:$0xff] }
 0x436   : >> { %v1897_v14 = vld [vmem:[#allocation2 + $0x40] ss:$4 sm:$0xff] }
 0x438   : >> { %4583 = vrot.lane.b32.xlu0 %v4582_v25, %s4825_s1 }
 0x439   : >> { %v1907_v27 = vld [vmem:[#allocation2 + $0x61] ss:$4 sm:$0xff]  ;;  %v1915_v29 = vld [vmem:[#allocation2 + $0x62] ss:$4 sm:$0xff]  ;;  %v1923_v32 = vld [vmem:[#allocation2 + $0x63] ss:$4 sm:$0xff] }
 0x43a   : >> { %v4587_v28 = vpack.i.bf16 %v1907_v27, %v1905_v26  ;;  %v4592_v31 = vpack.i.bf16 %v1915_v29, %v1913_v30  ;;  %v4597_v34 = vpack.i.bf16 %v1923_v32, %v1921_v33  ;;  %v1899_v63 = vld [vmem:[#allocation2 + $0x60] ss:$4 sm:$0xff] }
 0x43c   : >> { %4588 = vrot.lane.b32.xlu1 %v4587_v28, %s4824_s22 }
 0x440   : >> { %4593 = vrot.lane.b32.xlu1 %v4592_v31, %s4823_s18 }
 0x444   : >> { %4598 = vrot.lane.b32.xlu1 %v4597_v34, %s4825_s1 }
 0x4a6   : >> { %v4579_v35 = vpop.permute.xlu1 %4578  ;;  %v4574_v36 = vpop.permute.xlu0 %4573 }
 0x4a7   : >> { %v4576_v37 = vunpack.i.h.bf16 %v4574_v36  ;;  %v4575_v38 = vunpack.i.l.bf16 %v4574_v36  ;;  %v4581_v39 = vunpack.i.h.bf16 %v4579_v35  ;;  %v4580_v40 = vunpack.i.l.bf16 %v4579_v35 }
 0x4a9   : >> { %v1973_v43 = vsel %vm1528_vm2, %v1895_v41, %v4576_v37  ;;  %v1972_v45 = vsel %vm1528_vm2, %v1893_v42, %v4575_v38 }
 0x4aa   : >> { %v4584_v46 = vpop.permute.xlu0 %4583  ;;  %v1977_v51 = vsel %vm1976_vm3, %v1972_v45, %v4580_v40  ;;  %v1978_v53 = vsel %vm1976_vm3, %v1973_v43, %v4581_v39 }
 0x4ab   : >> { %v4586_v47 = vunpack.i.h.bf16 %v4584_v46  ;;  %v4585_v50 = vunpack.i.l.bf16 %v4584_v46 }
 0x4ad   : >> { %v1982_v54 = vsel %vm1981_vm4, %v1977_v51, %v4585_v50  ;;  %v1983_v55 = vsel %vm1981_vm4, %v1978_v53, %v4586_v47 }
 0x4ae   : >> { %v1986_v56 = vpack.c.bf16 %v1983_v55, %v1982_v54  ;;  %v4589_v57 = vpop.permute.xlu1 %4588 }
 0x4af   : >> { %v4591_v59 = vunpack.i.h.bf16 %v4589_v57  ;;  %v4590_v60 = vunpack.i.l.bf16 %v4589_v57 }
 0x4b0   : >> { %4329 = vmatprep.mubr.msk.bf16.mxu1 %vm1094_vm0, %v1986_v56 }
 0x4b1   : >> { %v1975_v16 = vsel %vm1528_vm2, %v1899_v63, %v4591_v59  ;;  %v1974_v17 = vsel %vm1528_vm2, %v1897_v14, %v4590_v60  ;;  %v4640_v59 = vld [vmem:[%s2153_s10] sm:$0xff]   ;;  %v4641_v60 = vld [vmem:[%s2153_s10 + $0x8] sm:$0xff]   ;;  %s5513_s10 = sld [smem:[#allocation15_spill]] }
 0x4b2   : >> { %v4594_v58 = vpop.permute.xlu1 %4593  ;;  %4333 = vmatprep.subr.bf16.mxu0 %v4640_v59 }
 0x4b3   : >> { %v4596_v61 = vunpack.i.h.bf16 %v4594_v58  ;;  %v4595_v62 = vunpack.i.l.bf16 %v4594_v58  ;;  %4334 = vmatpush3.bf16.msra.mxu0 %v4640_v59 }
 0x4b4   : >> { %4335 = vmatprep.subr.bf16.mxu0 %v4641_v60 }
 0x4b5   : >> { %v1979_v20 = vsel %vm1976_vm3, %v1974_v17, %v4595_v62  ;;  %v1980_v21 = vsel %vm1976_vm3, %v1975_v16, %v4596_v61 }
 0x4b6   : >> { %v4599_v15 = vpop.permute.xlu1 %4598 }
 0x4b7   : >> { %v4601_v18 = vunpack.i.h.bf16 %v4599_v15  ;;  %v4600_v19 = vunpack.i.l.bf16 %v4599_v15  ;;  %4336 = vmatpush3.bf16.msra.mxu0 %v4641_v60 }
 0x4b9   : >> { %v1984_v48 = vsel %vm1981_vm4, %v1979_v20, %v4600_v19  ;;  %v1985_v23 = vsel %vm1981_vm4, %v1980_v21, %v4601_v18 }
 0x4ba   : >> { %v1987_v52 = vpack.c.bf16 %v1985_v23, %v1984_v48 }
 0x4bc   : >> { %4330 = vmatmul.mubr.msk.bf16.vlgmr.msra.gmra.mrb[20].mxu1 %vm1094_vm0, %v1987_v52  ;;  %v4036_v52 = vld [vmem:[%s2073_s11] ss:$0 sm:$0xff]  ;;  %s2158_s11 = scalar_lea.vmem %s5513_s10, %s4786_s26  ;;  %s5516_s10 = sld [smem:[#allocation3_spill]] }
 0x58f   : >> { %v4331_v24 = vpop.f32.mrb[20].mxu1 }
 0x590   : >> { %v2054_v25 = vpop.f32.mrb[21].mxu1  ;;  %v2063_v49 = vadd.f32 %v4331_v24, %v4031_v44 }
 0x591   : >> { %v2055_v26 = vadd.f32 %v4031_v44, %v2054_v25  ;;  %v4332_v27 = vpop.f32.mrb[22].mxu1 }
 0x592   : >> { %v2057_v28 = vpop.f32.mrb[23].mxu1  ;;  %v5194_v31 = vadd.f32 %v4774_v4, %v2063_v49  ;;  %v2066_v32 = vadd.f32 %v4332_v27, %v4031_v44  ;;  %v4037_v27 = vld [vmem:[%s2075_s0] ss:$0 sm:$0xff]  ;;  %s5514_s0 = sld [smem:[#allocation17_spill]] }
 0x593   : >> { %v5191_v29 = vadd.f32 %v4782_v2, %v2055_v26  ;;  %v2058_v30 = vadd.f32 %v4031_v44, %v2057_v28 }
 0x594   : >> { %v5204_v36 = vadd.f32 %v4770_v5, %v2066_v32  ;;  %v2083_v2 = vsel %vm1094_vm0, %v5194_v31, 0.0 }
 0x595   : >> { %v5197_v33 = vadd.f32 %v4778_v3, %v2058_v30  ;;  %v2077_v34 = vsel %vm1094_vm0, %v5191_v29, 0.0 }
 0x596   : >> { %2078 = vadd.xlane.f32.xlu0 %v2077_v34  ;;  %v2086_v4 = vsel %vm1094_vm0, %v5204_v36, 0.0 }
 0x597   : >> { %v2080_v35 = vsel %vm1094_vm0, %v5197_v33, 0.0 }
 0x598   : >> { %2081 = vadd.xlane.f32.xlu1 %v2080_v35  ;;  %s2290_s15 = scalar_lea.vmem %s5514_s0, %s4786_s26  ;;  %s5517_s0 = sld [smem:[#allocation7_spill]] }
 0x59a   : >> { %2084 = vadd.xlane.f32.xlu0 %v2083_v2 }
 0x59e   : >> { %2087 = vadd.xlane.f32.xlu0 %v2086_v4 }
 0x623   : >> { %v2079_v3 = vpop.xlane.xlu0 %2078 }
 0x624   : >> { %v2090_v37 = vmul.f32 0.03125, %v2079_v3 }
 0x625   : >> { %v2082_v38 = vpop.xlane.xlu1 %2081 }
 0x626   : >> { %v2094_v39 = vsub.f32 %v5191_v29, %v2090_v37  ;;  %v2091_v40 = vmul.f32 0.03125, %v2082_v38 }
 0x627   : >> { %v2085_v41 = vpop.xlane.xlu0 %2084 }
 0x628   : >> { %v2095_v42 = vsub.f32 %v5197_v33, %v2091_v40  ;;  %v2092_v43 = vmul.f32 0.03125, %v2085_v41  ;;  %v2098_v5 = vmul.f32 %v2094_v39, %v2094_v39  ;;  %v4642_v41 = vld [vmem:[%s2273_s2] sm:$0xff]  }
 0x629   : >> { %4341 = vmatprep.subr.bf16.mxu1 %v4642_v41 }
 0x62a   : >> { %v2096_v45 = vsub.f32 %v5194_v31, %v2092_v43  ;;  %v2102_v46 = vsel %vm1094_vm0, %v2098_v5, 0.0  ;;  %v2099_v47 = vmul.f32 %v2095_v42, %v2095_v42  ;;  %4342 = vmatpush3.bf16.msra.mxu1 %v4642_v41  ;;  %v4644_v43 = vld [vmem:[%s2273_s2 + $0x10] sm:$0xff]   ;;  %v4645_v5 = vld [vmem:[%s2273_s2 + $0x18] sm:$0xff]  }
 0x62b   : >> { %2103 = vadd.xlane.f32.xlu0 %v2102_v46  ;;  %v2088_v50 = vpop.xlane.xlu0 %2087  ;;  %v4647_v46 = vld [vmem:[%s2273_s2 + $0x28] sm:$0xff]  }
 0x62c   : >> { %v2093_v51 = vmul.f32 0.03125, %v2088_v50  ;;  %v2105_v53 = vsel %vm1094_vm0, %v2099_v47, 0.0  ;;  %v2100_v54 = vmul.f32 %v2096_v45, %v2096_v45  ;;  %v4648_v47 = vld [vmem:[%s2273_s2 + $0x30] sm:$0xff]   ;;  %v4649_v50 = vld [vmem:[%s2273_s2 + $0x38] sm:$0xff]  }
 0x62d   : >> { %2106 = vadd.xlane.f32.xlu1 %v2105_v53 }
 0x62e   : >> { %v2097_v55 = vsub.f32 %v5204_v36, %v2093_v51  ;;  %v2108_v56 = vsel %vm1094_vm0, %v2100_v54, 0.0  ;;  %v4039_v51 = vld [vmem:[%s2158_s11] ss:$0 sm:$0xff] }
 0x62f   : >> { %2109 = vadd.xlane.f32.xlu0 %v2108_v56 }
 0x630   : >> { %v2101_v57 = vmul.f32 %v2097_v55, %v2097_v55 }
 0x632   : >> { %v2111_v58 = vsel %vm1094_vm0, %v2101_v57, 0.0 }
 0x633   : >> { %2112 = vadd.xlane.f32.xlu1 %v2111_v58 }
 0x6b8   : >> { %v2104_v61 = vpop.xlane.xlu0 %2103 }
 0x6b9   : >> { %v2114_v62 = vmul.f32 0.03125, %v2104_v61 }
 0x6ba   : >> { %v2107_v63 = vpop.xlane.xlu1 %2106 }
 0x6bb   : >> { %v2118_v14 = vadd.f32 1e-05, %v2114_v62  ;;  %v2115_v15 = vmul.f32 0.03125, %v2107_v63 }
 0x6bc   : >> { %v2110_v16 = vpop.xlane.xlu0 %2109 }
 0x6bd   : >> { %4684 = vrsqrt.f32 %v2118_v14  ;;  %v2119_v17 = vadd.f32 1e-05, %v2115_v15  ;;  %v2116_v18 = vmul.f32 0.03125, %v2110_v16 }
 0x6bf   : >> { %4686 = vrsqrt.f32 %v2119_v17  ;;  %v2120_v19 = vadd.f32 1e-05, %v2116_v18 }
 0x6c0   : >> { %v2113_v20 = vpop.xlane.xlu1 %2112 }
 0x6c1   : >> { %4688 = vrsqrt.f32 %v2120_v19  ;;  %v2117_v21 = vmul.f32 0.03125, %v2113_v20 }
 0x6c3   : >> { %v2121_v48 = vadd.f32 1e-05, %v2117_v21 }
 0x6c5   : >> { %4690 = vrsqrt.f32 %v2121_v48 }
 0x6c7   : >> { %v4685_v23 = vpop.eup %4684 }
 0x6c8   : >> { %v2126_v44 = vmul.f32 %v4685_v23, %v2094_v39 }
 0x6c9   : >> { %v4687_v24 = vpop.eup %4686 }
 0x6ca   : >> { %v2127_v25 = vmul.f32 %v4687_v24, %v2095_v42  ;;  %v2136_v49 = vmul.f32 %v4036_v52, %v2126_v44  ;;  %v4643_v42 = vld [vmem:[%s2273_s2 + $0x8] sm:$0xff]  }
 0x6cb   : >> { %v4689_v26 = vpop.eup %4688  ;;  %4343 = vmatprep.subr.bf16.mxu1 %v4643_v42 }
 0x6cc   : >> { %v2128_v28 = vmul.f32 %v4689_v26, %v2096_v45  ;;  %v2137_v30 = vmul.f32 %v4036_v52, %v2127_v25  ;;  %v2146_v32 = vadd.f32 %v4037_v27, %v2136_v49  ;;  %4344 = vmatpush3.bf16.msra.mxu1 %v4643_v42  ;;  %v4646_v45 = vld [vmem:[%s2273_s2 + $0x20] sm:$0xff]   ;;  %s5515_s2 = sld [smem:[#allocation5_spill]] }
 0x6cd   : >> { %4345 = vmatprep.subr.bf16.mxu1 %v4644_v43 }
 0x6ce   : >> { %v2147_v34 = vadd.f32 %v4037_v27, %v2137_v30  ;;  %v2138_v2 = vmul.f32 %v4036_v52, %v2128_v28 }
 0x6cf   : >> { %v4691_v35 = vpop.eup %4690 }
 0x6d0   : >> { %v2129_v4 = vmul.f32 %v4691_v35, %v2097_v55  ;;  %v2150_v3 = vpack.c.bf16 %v2147_v34, %v2146_v32  ;;  %v2148_v38 = vadd.f32 %v4037_v27, %v2138_v2  ;;  %4346 = vmatpush3.bf16.msra.mxu1 %v4644_v43 }
 0x6d1   : >> { %4347 = vmatprep.subr.bf16.mxu1 %v4645_v5 }
 0x6d2   : >> { %v2139_v37 = vmul.f32 %v4036_v52, %v2129_v4  ;;  %4337 = vmatprep.mubr.msk.bf16.mxu0 %vm1094_vm0, %v2150_v3  ;;  %s2579_s11 = scalar_lea.vmem %s5515_s2, %s5062_s28  ;;  %s5302_s2 = scalar_lea.vmem %s5517_s0, %s5062_s28 }
 0x6d4   : >> { %v2149_v39 = vadd.f32 %v4037_v27, %v2139_v37  ;;  %4348 = vmatpush3.bf16.msra.mxu1 %v4645_v5 }
 0x6d5   : >> { %4349 = vmatprep.subr.bf16.mxu1 %v4646_v45 }
 0x6d6   : >> { %v2151_v40 = vpack.c.bf16 %v2149_v39, %v2148_v38 }
 0x6d8   : >> { %4338 = vmatmul.mubr.msk.bf16.vlgmr.msra.gmra.mrb[24].mxu0 %vm1094_vm0, %v2151_v40  ;;  %4350 = vmatpush3.bf16.msra.mxu1 %v4646_v45 }
 0x6d9   : >> { %4351 = vmatprep.subr.bf16.mxu1 %v4647_v46 }
 0x6dc   : >> { %4352 = vmatpush3.bf16.msra.mxu1 %v4647_v46 }
 0x6dd   : >> { %4353 = vmatprep.subr.bf16.mxu1 %v4648_v47 }
 0x6e0   : >> { %4354 = vmatpush3.bf16.msra.mxu1 %v4648_v47  ;;  %v4046_v47 = vld [vmem:[%s2290_s15] ss:$0 sm:$0xff]  ;;  %s2478_s15 = scalar_lea.vmem %s5516_s10, %s5062_s28  ;;  %s5518_s10 = sld [smem:[#allocation11_spill]] }
 0x6e1   : >> { %4355 = vmatprep.subr.bf16.mxu1 %v4649_v50 }
 0x6e4   : >> { %4356 = vmatpush3.bf16.msra.mxu1 %v4649_v50 }
 0x6e6   : >> { %s2399_s0 = scalar_lea.vmem %s5518_s10, %s4786_s26  ;;  %s5520_s10 = sld [smem:[#allocation6_spill]] }
 0x7ab   : >> { %v4339_v53 = vpop.f32.mrb[24].mxu0 }
 0x7ac   : >> { %v2227_v54 = vadd.f32 %v4339_v53, %v4039_v51  ;;  %v2218_v55 = vpop.f32.mrb[25].mxu0 }
 0x7ad   : >> { %v2219_v56 = vadd.f32 %v4039_v51, %v2218_v55  ;;  %v4340_v57 = vpop.f32.mrb[26].mxu0 }
 0x7ae   : >> { %v2239_v58 = vmul.f32 0.044715, %v2227_v54  ;;  %v2230_v59 = vadd.f32 %v4340_v57, %v4039_v51  ;;  %v2221_v60 = vpop.f32.mrb[27].mxu0  ;;  %v2235_v4 = vmul.f32 0.5, %v2227_v54 }
 0x7af   : >> { %v2237_v61 = vmul.f32 0.044715, %v2219_v56  ;;  %v2222_v62 = vadd.f32 %v4039_v51, %v2221_v60  ;;  %v2233_v38 = vmul.f32 0.5, %v2219_v56 }
 0x7b0   : >> { %v2243_v63 = vmul.f32 %v2239_v58, %v2227_v54  ;;  %v2240_v14 = vmul.f32 0.044715, %v2230_v59  ;;  %v2236_v3 = vmul.f32 0.5, %v2230_v59 }
 0x7b1   : >> { %v2241_v15 = vmul.f32 %v2237_v61, %v2219_v56  ;;  %v2238_v16 = vmul.f32 0.044715, %v2222_v62  ;;  %v2234_v39 = vmul.f32 0.5, %v2222_v62 }
 0x7b2   : >> { %v2247_v17 = vmul.f32 %v2243_v63, %v2227_v54  ;;  %v2244_v18 = vmul.f32 %v2240_v14, %v2230_v59 }
 0x7b3   : >> { %v2245_v19 = vmul.f32 %v2241_v15, %v2219_v56  ;;  %v2242_v20 = vmul.f32 %v2238_v16, %v2222_v62 }
 0x7b4   : >> { %v2251_v21 = vadd.f32 %v2247_v17, %v2227_v54  ;;  %v2248_v48 = vmul.f32 %v2244_v18, %v2230_v59 }
 0x7b5   : >> { %v2246_v23 = vmul.f32 %v2242_v20, %v2222_v62  ;;  %v2249_v52 = vadd.f32 %v2245_v19, %v2219_v56 }
 0x7b6   : >> { %v2255_v44 = vmul.f32 0.7978846, %v2251_v21  ;;  %v2252_v24 = vadd.f32 %v2248_v48, %v2230_v59 }
 0x7b7   : >> { %v2250_v25 = vadd.f32 %v2246_v23, %v2222_v62  ;;  %v2253_v49 = vmul.f32 0.7978846, %v2249_v52 }
 0x7b8   : >> { %4692 = vtanh.f32 %v2255_v44  ;;  %v2256_v26 = vmul.f32 0.7978846, %v2252_v24 }
 0x7b9   : >> { %v2254_v27 = vmul.f32 0.7978846, %v2250_v25  ;;  %4694 = vtanh.f32 %v2253_v49 }
 0x7ba   : >> { %4696 = vtanh.f32 %v2256_v26 }
 0x7bb   : >> { %4698 = vtanh.f32 %v2254_v27 }
 0x7c2   : >> { %v4693_v28 = vpop.eup %4692 }
 0x7c3   : >> { %v4695_v30 = vpop.eup %4694  ;;  %v2263_v32 = vadd.f32 1.0, %v4693_v28 }
 0x7c4   : >> { %v4697_v34 = vpop.eup %4696  ;;  %v2261_v35 = vadd.f32 1.0, %v4695_v30 }
 0x7c5   : >> { %v4699_v2 = vpop.eup %4698  ;;  %v2264_v37 = vadd.f32 1.0, %v4697_v34  ;;  %v2267_v41 = vmul.f32 %v2263_v32, %v2235_v4  ;;  %v4650_v32 = vld [vmem:[%s2579_s11] sm:$0xff]   ;;  %v4651_v34 = vld [vmem:[%s2579_s11 + $0x8] sm:$0xff]   ;;  %v2576_v4 = vpack.c.bf16 %v5030_v11, %v5028_v10  ;;  %s5519_s11 = sld [smem:[#allocation12_spill]] }
 0x7c6   : >> { %v2262_v40 = vadd.f32 1.0, %v4699_v2  ;;  %v2265_v43 = vmul.f32 %v2261_v35, %v2233_v38  ;;  %4369 = vmatprep.subr.bf16.mxu1 %v4650_v32  ;;  %v2574_v35 = vpack.c.bf16 %v5022_v7, %v5020_v6  ;;  %v5284_v2 = vpack.c.bf16 %v5026_v9, %v5024_v8  ;;  %v4653_v38 = vld [vmem:[%s2478_s15 + $0x8] sm:$0xff]  }
 0x7c7   : >> { %v2268_v42 = vmul.f32 %v2264_v37, %v2236_v3  ;;  %v2577_v3 = vpack.c.bf16 %v5034_v13, %v5032_v12  ;;  %v4652_v37 = vld [vmem:[%s2478_s15] sm:$0xff]  }
 0x7c8   : >> { %v2266_v5 = vmul.f32 %v2262_v40, %v2234_v39  ;;  %4361 = vmatprep.subr.bf16.mxu0 %v4652_v37  ;;  %v4654_v39 = vld [vmem:[%s5302_s2] sm:$0xff]  }
 0x7c9   : >> { %v2270_v45 = vpack.c.bf16 %v2268_v42, %v2267_v41  ;;  %4362 = vmatpush3.bf16.msra.mxu0 %v4652_v37 }
 0x7ca   : >> { %v2269_v46 = vpack.c.bf16 %v2266_v5, %v2265_v43  ;;  %4363 = vmatprep.subr.bf16.mxu0 %v4653_v38 }
 0x7cb   : >> { %s2401_s15 = scalar_lea.vmem %s5519_s11, %s4786_s26  ;;  %s5521_s11 = sld [smem:[#allocation4_spill]] }
 0x7cc   : >> { %4357 = vmatprep.mubr.bf16.mxu1 %v2269_v46 }
 0x7cd   : >> { %4358 = vmatmul.mubr.bf16.vlgmr.msra.gmra.mrb[24].mxu1 %v2270_v45  ;;  %4364 = vmatpush3.bf16.msra.mxu0 %v4653_v38 }
 0x7ce   : >> { %4370 = vmatpush3.bf16.msra.mxu1 %v4650_v32  ;;  %4373 = vmatprep.mubr.msk.bf16.mxu1 %vm1094_vm0, %v2574_v35 }
 0x7cf   : >> { %4371 = vmatprep.subr.bf16.mxu1 %v4651_v34  ;;  %4381 = vmatprep.subr.bf16.mxu0 %v4654_v39 }
 0x7d2   : >> { %4372 = vmatpush3.bf16.msra.mxu1 %v4651_v34 }
 0x7d3   : >> { %4393 = vmatprep.subr.bf16.mxu1 %v4821_v22 }
 0x7d5   : >> { %4374 = vmatmul.mubr.msk.bf16.vlgmr.msra.gmra.mrb[28].mxu1 %vm1094_vm0, %v5284_v2 }
 0x7d6   : >> { %4377 = vmatprep.mubr.msk.bf16.mxu1 %vm1094_vm0, %v2576_v4 }
 0x7dd   : >> { %4378 = vmatmul.mubr.msk.bf16.gmra.mrb[32].mxu1 %vm1094_vm0, %v2577_v3 }
 0x7de   : >> { %4395 = vmatprep.mubr.msk.bf16.mxu1 %vm4822_vm1, %v4821_v22 }
 0x8a0   : >> { %v4359_v50 = vpop.f32.mrb[24].mxu1 }
 0x8a1   : >> { %v2380_v51 = vpop.f32.mrb[25].mxu1  ;;  %v2389_v53 = vadd.f32 %v4359_v50, %v4046_v47 }
 0x8a2   : >> { %v2381_v55 = vadd.f32 %v4046_v47, %v2380_v51  ;;  %v4360_v54 = vpop.f32.mrb[26].mxu1 }
 0x8a3   : >> { %v2383_v57 = vpop.f32.mrb[27].mxu1  ;;  %v2392_v58 = vadd.f32 %v4360_v54, %v4046_v47  ;;  %v5238_v60 = vadd.f32 %v2389_v53, %v5194_v31 }
 0x8a4   : >> { %v5235_v56 = vadd.f32 %v2381_v55, %v5191_v29  ;;  %v2384_v59 = vadd.f32 %v4046_v47, %v2383_v57  ;;  %v4055_v57 = vld [vmem:[%s2399_s0] ss:$0 sm:$0xff]  ;;  %s5522_s0 = sld [smem:[#allocation8_spill]] }
 0x8a5   : >> { %v5246_v63 = vadd.f32 %v2392_v58, %v5204_v36  ;;  %v2409_v29 = vsel %vm1094_vm0, %v5238_v60, 0.0 }
 0x8a6   : >> { %v5241_v61 = vadd.f32 %v2384_v59, %v5197_v33  ;;  %v2403_v62 = vsel %vm1094_vm0, %v5235_v56, 0.0 }
 0x8a7   : >> { %2404 = vadd.xlane.f32.xlu0 %v2403_v62  ;;  %v2412_v31 = vsel %vm1094_vm0, %v5246_v63, 0.0 }
 0x8a8   : >> { %v2406_v14 = vsel %vm1094_vm0, %v5241_v61, 0.0 }
 0x8a9   : >> { %2407 = vadd.xlane.f32.xlu1 %v2406_v14 }
 0x8ab   : >> { %2410 = vadd.xlane.f32.xlu0 %v2409_v29 }
 0x8ad   : >> { %2413 = vadd.xlane.f32.xlu1 %v2412_v31  ;;  %v4056_v31 = vld [vmem:[%s2401_s15] ss:$0 sm:$0xff]  ;;  %s2483_s15 = scalar_lea.vmem %s5521_s11, %s4786_s26 }
 0x934   : >> { %v2405_v33 = vpop.xlane.xlu0 %2404 }
 0x935   : >> { %v2415_v15 = vmul.f32 0.03125, %v2405_v33 }
 0x936   : >> { %v2408_v16 = vpop.xlane.xlu1 %2407 }
 0x937   : >> { %v5255_v17 = vsub.f32 %v5235_v56, %v2415_v15  ;;  %v2416_v36 = vmul.f32 0.03125, %v2408_v16 }
 0x938   : >> { %v2411_v18 = vpop.xlane.xlu0 %2410 }
 0x939   : >> { %v5258_v19 = vsub.f32 %v5241_v61, %v2416_v36  ;;  %v2417_v20 = vmul.f32 0.03125, %v2411_v18  ;;  %v2423_v21 = vmul.f32 %v5255_v17, %v5255_v17 }
 0x93a   : >> { %v2414_v48 = vpop.xlane.xlu1 %2413 }
 0x93b   : >> { %v5263_v23 = vsub.f32 %v5238_v60, %v2417_v20  ;;  %v2418_v52 = vmul.f32 0.03125, %v2414_v48  ;;  %v2427_v44 = vsel %vm1094_vm0, %v2423_v21, 0.0  ;;  %v2424_v24 = vmul.f32 %v5258_v19, %v5258_v19 }
 0x93c   : >> { %2428 = vadd.xlane.f32.xlu0 %v2427_v44 }
 0x93d   : >> { %v5269_v25 = vsub.f32 %v5246_v63, %v2418_v52  ;;  %v2430_v49 = vsel %vm1094_vm0, %v2424_v24, 0.0  ;;  %v2425_v26 = vmul.f32 %v5263_v23, %v5263_v23  ;;  %v4655_v24 = vld [vmem:[%s5302_s2 + $0x8] sm:$0xff]   ;;  %s2584_s2 = scalar_lea.vmem %s5520_s10, %s4786_s26  ;;  %s2691_s10 = scalar_lea.vmem %s5522_s0, %s4786_s26 }
 0x93e   : >> { %2431 = vadd.xlane.f32.xlu1 %v2430_v49 }
 0x93f   : >> { %v2433_v27 = vsel %vm1094_vm0, %v2425_v26, 0.0  ;;  %v2426_v28 = vmul.f32 %v5269_v25, %v5269_v25 }
 0x940   : >> { %2434 = vadd.xlane.f32.xlu0 %v2433_v27 }
 0x941   : >> { %v2436_v30 = vsel %vm1094_vm0, %v2426_v28, 0.0 }
 0x942   : >> { %2437 = vadd.xlane.f32.xlu1 %v2436_v30 }
 0x9c9   : >> { %v2429_v40 = vpop.xlane.xlu0 %2428 }
 0x9ca   : >> { %v2439_v41 = vmul.f32 0.03125, %v2429_v40 }
 0x9cb   : >> { %v2432_v42 = vpop.xlane.xlu1 %2431 }
 0x9cc   : >> { %v2443_v43 = vadd.f32 1e-05, %v2439_v41  ;;  %v2440_v5 = vmul.f32 0.03125, %v2432_v42 }
 0x9cd   : >> { %v2435_v45 = vpop.xlane.xlu0 %2434 }
 0x9ce   : >> { %4700 = vrsqrt.f32 %v2443_v43  ;;  %v2444_v46 = vadd.f32 1e-05, %v2440_v5  ;;  %v2441_v47 = vmul.f32 0.03125, %v2435_v45 }
 0x9cf   : >> { %v2438_v50 = vpop.xlane.xlu1 %2437 }
 0x9d0   : >> { %4702 = vrsqrt.f32 %v2444_v46  ;;  %v2445_v51 = vadd.f32 1e-05, %v2441_v47  ;;  %v2442_v53 = vmul.f32 0.03125, %v2438_v50  ;;  %v4058_v47 = vld [vmem:[%s2483_s15] ss:$0 sm:$0xff]  ;;  %s5526_s15 = sld [smem:[#allocation13_spill]] }
 0x9d2   : >> { %4704 = vrsqrt.f32 %v2445_v51  ;;  %v2446_v55 = vadd.f32 1e-05, %v2442_v53 }
 0x9d4   : >> { %4706 = vrsqrt.f32 %v2446_v55 }
 0x9d8   : >> { %v4701_v54 = vpop.eup %4700 }
 0x9d9   : >> { %v2451_v58 = vmul.f32 %v4701_v54, %v5255_v17 }
 0x9da   : >> { %v4703_v59 = vpop.eup %4702 }
 0x9db   : >> { %v2452_v62 = vmul.f32 %v4703_v59, %v5258_v19  ;;  %v2461_v14 = vmul.f32 %v4055_v57, %v2451_v58 }
 0x9dc   : >> { %v4705_v29 = vpop.eup %4704 }
 0x9dd   : >> { %v2453_v33 = vmul.f32 %v4705_v29, %v5263_v23  ;;  %v2462_v15 = vmul.f32 %v4055_v57, %v2452_v62  ;;  %v2471_v20 = vadd.f32 %v4056_v31, %v2461_v14  ;;  %v4068_v23 = vld [vmem:[%s2584_s2] ss:$0 sm:$0xff]  ;;  %s5523_s2 = sld [smem:[#allocation9_spill]] }
 0x9de   : >> { %v4707_v16 = vpop.eup %4706 }
 0x9df   : >> { %v2463_v36 = vmul.f32 %v4055_v57, %v2453_v33  ;;  %v2454_v18 = vmul.f32 %v4707_v16, %v5269_v25  ;;  %v2472_v21 = vadd.f32 %v4056_v31, %v2462_v15  ;;  %v4375_v25 = vpop.f32.mrb[28].mxu1 }
 0x9e0   : >> { %v2659_v49 = vadd.f32 %v4375_v25, %v4068_v23  ;;  %v2650_v26 = vpop.f32.mrb[29].mxu1 }
 0x9e1   : >> { %v2464_v48 = vmul.f32 %v4055_v57, %v2454_v18  ;;  %v2475_v52 = vpack.c.bf16 %v2472_v21, %v2471_v20  ;;  %v2473_v17 = vadd.f32 %v4056_v31, %v2463_v36  ;;  %v2651_v27 = vadd.f32 %v4068_v23, %v2650_v26  ;;  %v4376_v28 = vpop.f32.mrb[30].mxu1 }
 0x9e2   : >> { %v2662_v30 = vadd.f32 %v4376_v28, %v4068_v23  ;;  %v2653_v32 = vpop.f32.mrb[31].mxu1 }
 0x9e3   : >> { %4365 = vmatprep.mubr.msk.bf16.mxu0 %vm1094_vm0, %v2475_v52  ;;  %v2474_v19 = vadd.f32 %v4056_v31, %v2464_v48  ;;  %v2654_v34 = vadd.f32 %v4068_v23, %v2653_v32  ;;  %v4076_v31 = vld [vmem:[%s2691_s10] ss:$0 sm:$0xff]  ;;  %s3403_s11 = scalar_lea.vmem %s5523_s2, %s5062_s28  ;;  %s5527_s10 = sld [smem:[#allocation14_spill]] }
 0x9e5   : >> { %v2476_v44 = vpack.c.bf16 %v2474_v19, %v2473_v17  ;;  %v2681_v37 = vpack.c.bf16 %v2654_v34, %v2651_v27 }
 0x9e7   : >> { %4366 = vmatmul.mubr.msk.bf16.vlgmr.msra.gmra.mrb[28].mxu0 %vm1094_vm0, %v2476_v44 }
 0x9e8   : >> { %4382 = vmatpush3.bf16.msra.mxu0 %v4654_v39  ;;  %4385 = vmatprep.mubr.msk.bf16.mxu0 %vm1094_vm0, %v2574_v35  ;;  %v2682_v35 = vpack.c.bf16 %v2662_v30, %v2659_v49 }
 0x9e9   : >> { %4383 = vmatprep.subr.bf16.mxu0 %v4655_v24  ;;  %s3489_s2 = scalar_lea.vmem %s5527_s10, %s4786_s26 }
 0x9ea   : >> { %v2830_v33 = vsel %vm1094_vm0, %v2682_v35, 0 }
 0x9ec   : >> { %4384 = vmatpush3.bf16.msra.mxu0 %v4655_v24 }
 0x9ed   : >> { %4405 = vmatprep.subr.bf16.mxu0 %v4821_v22 }
 0x9ef   : >> { %4386 = vmatmul.mubr.msk.bf16.vlgmr.msra.gmra.mrb[32].mxu0 %vm1094_vm0, %v5284_v2  ;;  %v2784_v2 = vsel %vm1094_vm0, %v2681_v37, 0 }
 0x9f0   : >> { %4389 = vmatprep.mubr.msk.bf16.mxu0 %vm1094_vm0, %v2576_v4  ;;  %v4379_v4 = vpop.f32.mrb[32].mxu1  ;;  %4394 = vmatpush3.bf16.xpose.msra.mxu1 %v2784_v2 }
 0x9f1   : >> { %v2666_v38 = vpop.f32.mrb[33].mxu1  ;;  %4399 = vmatprep.subr.bf16.mxu1 %v4821_v22 }
 0x9f2   : >> { %v2667_v39 = vadd.f32 %v4068_v23, %v2666_v38  ;;  %v4380_v40 = vpop.f32.mrb[34].mxu1 }
 0x9f3   : >> { %v2678_v41 = vadd.f32 %v4380_v40, %v4068_v23  ;;  %v2669_v42 = vpop.f32.mrb[35].mxu1 }
 0x9f4   : >> { %v2670_v43 = vadd.f32 %v4068_v23, %v2669_v42 }
 0x9f6   : >> { %v2683_v45 = vpack.c.bf16 %v2670_v43, %v2667_v39 }
 0x9f7   : >> { %4390 = vmatmul.mubr.msk.bf16.gmra.mrb[36].mxu0 %vm1094_vm0, %v2577_v3  ;;  %v2675_v3 = vadd.f32 %v4379_v4, %v4068_v23 }
 0x9f8   : >> { %4407 = vmatprep.mubr.msk.bf16.mxu0 %vm4822_vm1, %v4821_v22  ;;  %v2876_v46 = vsel %vm1094_vm0, %v2683_v45, 0 }
 0x9f9   : >> { %v2684_v5 = vpack.c.bf16 %v2678_v41, %v2675_v3  ;;  %4406 = vmatpush3.bf16.xpose.msra.mxu0 %v2876_v46 }
 0x9fb   : >> { %v2922_v25 = vsel %vm1094_vm0, %v2684_v5, 0 }
 0xaba   : >> { %v4367_v50 = vpop.f32.mrb[28].mxu0 }
 0xabb   : >> { %v2552_v51 = vadd.f32 %v4367_v50, %v4058_v47  ;;  %v2543_v53 = vpop.f32.mrb[29].mxu0 }
 0xabc   : >> { %v2544_v55 = vadd.f32 %v4058_v47, %v2543_v53  ;;  %v4368_v54 = vpop.f32.mrb[30].mxu0 }
 0xabd   : >> { %v2560_v57 = vmul.f32 0.35355338, %v2552_v51  ;;  %v2546_v58 = vpop.f32.mrb[31].mxu0  ;;  %v2555_v44 = vadd.f32 %v4368_v54, %v4058_v47 }
 0xabe   : >> { %v2558_v59 = vmul.f32 0.35355338, %v2544_v55  ;;  %v2547_v29 = vadd.f32 %v4058_v47, %v2546_v58 }
 0xabf   : >> { %v4142_v62 = vpack.c.bf16 %v2560_v57, %v2560_v57  ;;  %v2561_v27 = vmul.f32 0.35355338, %v2555_v44 }
 0xac0   : >> { %v4140_v14 = vpack.c.bf16 %v2558_v59, %v2558_v59  ;;  %v2559_v18 = vmul.f32 0.35355338, %v2547_v29 }
 0xac1   : >> { %4408 = vmatmul.mubr.msk.bf16.vlgmr.msra.gmra.mrb[40].mxu0 %vm1094_vm0, %v4142_v62  ;;  %v4143_v32 = vpack.c.bf16 %v2561_v27, %v2561_v27 }
 0xac2   : >> { %4396 = vmatmul.mubr.msk.bf16.vlgmr.msra.gmra.mrb[36].mxu1 %vm1094_vm0, %v4140_v14  ;;  %v4387_v15 = vpop.f32.mrb[32].mxu0  ;;  %v4141_v24 = vpack.c.bf16 %v2559_v18, %v2559_v18 }
 0xac3   : >> { %4400 = vmatpush3.bf16.xpose.msra.mxu1 %v2830_v33  ;;  %4401 = vmatprep.mubr.msk.bf16.mxu1 %vm4822_vm1, %v4821_v22  ;;  %v5338_v16 = vadd.f32 %v4387_v15, %v4076_v31  ;;  %v2745_v36 = vpop.f32.mrb[33].mxu0 }
 0xac4   : >> { %4411 = vmatprep.subr.bf16.mxu1 %v4821_v22  ;;  %v5341_v20 = vadd.f32 %v4076_v31, %v2745_v36  ;;  %v4388_v21 = vpop.f32.mrb[34].mxu0 }
 0xac5   : >> { %v5343_v48 = vadd.f32 %v4388_v21, %v4076_v31  ;;  %v2748_v52 = vpop.f32.mrb[35].mxu0 }
 0xac6   : >> { %v5345_v17 = vadd.f32 %v4076_v31, %v2748_v52 }
 0xac7   : >> { %v2777_v19 = vpack.c.bf16 %v5343_v48, %v5338_v16 }
 0xac8   : >> { %v2776_v23 = vpack.c.bf16 %v5345_v17, %v5341_v20 }
 0xaca   : >> { %4402 = vmatmul.mubr.msk.bf16.vlgmr.msra.gmra.mrb[40].mxu1 %vm1094_vm0, %v4141_v24  ;;  %v4391_v49 = vpop.f32.mrb[36].mxu0 }
 0xacb   : >> { %4412 = vmatpush3.bf16.xpose.msra.mxu1 %v2922_v25  ;;  %4413 = vmatprep.mubr.msk.bf16.mxu1 %vm4822_vm1, %v4821_v22  ;;  %v2761_v26 = vpop.f32.mrb[37].mxu0  ;;  %v2770_v34 = vadd.f32 %v4391_v49, %v4076_v31 }
 0xacc   : >> { %v4392_v28 = vpop.f32.mrb[38].mxu0  ;;  %v2762_v35 = vadd.f32 %v4076_v31, %v2761_v26 }
 0xacd   : >> { %v2764_v30 = vpop.f32.mrb[39].mxu0  ;;  %v2773_v37 = vadd.f32 %v4392_v28, %v4076_v31 }
 0xace   : >> { %v2765_v2 = vadd.f32 %v4076_v31, %v2764_v30 }
 0xacf   : >> { %v2779_v3 = vpack.c.bf16 %v2773_v37, %v2770_v34 }
 0xad0   : >> { %v2778_v4 = vpack.c.bf16 %v2765_v2, %v2762_v35 }
 0xad2   : >> { %4414 = vmatmul.mubr.msk.bf16.vlgmr.msra.gmra.mrb[44].mxu1 %vm1094_vm0, %v4143_v32 }
 0xb94   : >> { %v2912_v38 = vpop.f32.mrb[40].mxu0 }
 0xb95   : >> { %v2820_v39 = vpop.f32.mrb[36].mxu1  ;;  %v4409_v40 = vpop.f32.mrb[41].mxu0  ;;  %v2970_v46 = vsel %vm1976_vm3, %v2912_v38, -inf }
 0xb96   : >> { %v4397_v41 = vpop.f32.mrb[37].mxu1  ;;  %v2915_v42 = vpop.f32.mrb[42].mxu0  ;;  %v2964_v22 = vsel %vm1976_vm3, %v2820_v39, -inf }
 0xb97   : >> { %v4410_v43 = vpop.f32.mrb[43].mxu0  ;;  %2965 = vmax.xlane.f32.xlu0 %v2964_v22  ;;  %v2823_v5 = vpop.f32.mrb[38].mxu1 }
 0xb98   : >> { %v4398_v45 = vpop.f32.mrb[39].mxu1 }
 0xb9b   : >> { %2971 = vmax.xlane.f32.xlu0 %v2970_v46 }
 0xb9d   : >> { %v2866_v47 = vpop.f32.mrb[40].mxu1 }
 0xb9e   : >> { %v4403_v50 = vpop.f32.mrb[41].mxu1  ;;  %v2967_v51 = vsel %vm1976_vm3, %v2866_v47, -inf }
 0xb9f   : >> { %2968 = vmax.xlane.f32.xlu1 %v2967_v51  ;;  %v2869_v53 = vpop.f32.mrb[42].mxu1 }
 0xba0   : >> { %v4404_v55 = vpop.f32.mrb[43].mxu1 }
 0xba5   : >> { %v2958_v54 = vpop.f32.mrb[44].mxu1 }
 0xba6   : >> { %v4415_v57 = vpop.f32.mrb[45].mxu1  ;;  %v2973_v58 = vsel %vm1976_vm3, %v2958_v54, -inf }
 0xba7   : >> { %2974 = vmax.xlane.f32.xlu1 %v2973_v58  ;;  %v2961_v59 = vpop.f32.mrb[46].mxu1 }
 0xba8   : >> { %v4416_v62 = vpop.f32.mrb[47].mxu1 }
 0xc24   : >> { %v2966_v14 = vpop.xlane.xlu0 %2965 }
 0xc25   : >> { %v2976_v29 = vsub.f32 %v2820_v39, %v2966_v14 }
 0xc27   : >> { %v2980_v31 = vmul.f32 1.442695, %v2976_v29 }
 0xc28   : >> { %v2972_v33 = vpop.xlane.xlu0 %2971 }
 0xc29   : >> { %4708 = vpow2.f32 %v2980_v31  ;;  %v2978_v15 = vsub.f32 %v2912_v38, %v2972_v33 }
 0xc2b   : >> { %v2984_v36 = vmul.f32 1.442695, %v2978_v15 }
 0xc2c   : >> { %v2969_v18 = vpop.xlane.xlu1 %2968 }
 0xc2d   : >> { %4710 = vpow2.f32 %v2984_v36  ;;  %v2977_v21 = vsub.f32 %v2866_v47, %v2969_v18 }
 0xc2f   : >> { %v2982_v52 = vmul.f32 1.442695, %v2977_v21 }
 0xc31   : >> { %4712 = vpow2.f32 %v2982_v52 }
 0xc33   : >> { %v4709_v44 = vpop.eup %4708 }
 0xc34   : >> { %v2975_v24 = vpop.xlane.xlu1 %2974  ;;  %v2988_v25 = vsel %vm1976_vm3, %v4709_v44, 0.0 }
 0xc35   : >> { %v2979_v49 = vsub.f32 %v2958_v54, %v2975_v24  ;;  %2989 = vadd.xlane.f32.xlu0 %v2988_v25 }
 0xc37   : >> { %v4711_v26 = vpop.eup %4710  ;;  %v2986_v27 = vmul.f32 1.442695, %v2979_v49 }
 0xc38   : >> { %v2994_v28 = vsel %vm1976_vm3, %v4711_v26, 0.0 }
 0xc39   : >> { %4714 = vpow2.f32 %v2986_v27  ;;  %2995 = vadd.xlane.f32.xlu0 %v2994_v28 }
 0xc3b   : >> { %v4713_v30 = vpop.eup %4712 }
 0xc3c   : >> { %v2991_v32 = vsel %vm1976_vm3, %v4713_v30, 0.0 }
 0xc3d   : >> { %2992 = vadd.xlane.f32.xlu1 %v2991_v32 }
 0xc43   : >> { %v4715_v34 = vpop.eup %4714 }
 0xc44   : >> { %v2997_v35 = vsel %vm1976_vm3, %v4715_v34, 0.0 }
 0xc45   : >> { %2998 = vadd.xlane.f32.xlu1 %v2997_v35 }
 0xc66   : >> { %3012 = vxpose.xlu0.c.b16.start.end [1/1] (short) (narrow) %v2776_v23, 32 }
 0xc6b   : >> { %3160 = vxpose.xlu0.c.b16.start.end [1/1] (short) (narrow) %v2778_v4, 32 }
 0xc72   : >> { %3086 = vxpose.xlu1.c.b16.start.end [1/1] (short) (narrow) %v2777_v19, 32 }
 0xc77   : >> { %3234 = vxpose.xlu1.c.b16.start.end [1/1] (short) (narrow) %v2779_v3, 32 }
 0xcc2   : >> { %v2990_v37 = vpop.xlane.xlu0 %2989 }
 0xcc3   : >> { %4716 = vrcp.f32 %v2990_v37 }
 0xcc6   : >> { %v2996_v2 = vpop.xlane.xlu0 %2995 }
 0xcc7   : >> { %4718 = vrcp.f32 %v2996_v2 }
 0xcca   : >> { %v2993_v38 = vpop.xlane.xlu1 %2992 }
 0xccb   : >> { %4720 = vrcp.f32 %v2993_v38  ;;  %v4656_v38 = vld [vmem:[%s3403_s11] sm:$0xff]  }
 0xccc   : >> { %v3020_v39 = vpop.trf.xlu0 }
 0xccd   : >> { %v4717_v40 = vpop.eup %4716  ;;  %4419 = vmatprep.mubr.msk.bf16.mxu0 %vm1976_vm3, %v3020_v39 }
 0xcce   : >> { %v3004_v41 = vmul.f32 %v4717_v40, %v4709_v44  ;;  %v4657_v40 = vld [vmem:[%s3403_s11 + $0x8] sm:$0xff]   ;;  %s3685_s11 = scalar_lea.vmem %s4989_s20, %s4138_s16  ;;  %s3571_s16 = scalar_lea.vmem %s4984_s30, %s4786_s26 }
 0xcd0   : >> { %v3008_v42 = vpack.c.bf16 %v3004_v41, %v3004_v41  ;;  %v3021_v3 = vpop.trf.xlu0 }
 0xcd1   : >> { %v4719_v20 = vpop.eup %4718 }
 0xcd2   : >> { %4481 = vmatprep.subr.msk.bf16.mxu0 %vm1976_vm3, %v3008_v42  ;;  %v2999_v17 = vpop.xlane.xlu1 %2998  ;;  %v3035_v16 = vsel %vm1976_vm3, %v3008_v42, 0  ;;  %v3006_v48 = vmul.f32 %v4719_v20, %v4711_v26 }
 0xcd3   : >> { %4722 = vrcp.f32 %v2999_v17  ;;  %4418 = vmatpush3.bf16.xpose.msra.mxu0 %v3035_v16 }
 0xcd4   : >> { %v3010_v19 = vpack.c.bf16 %v3006_v48, %v3006_v48  ;;  %v3168_v46 = vpop.trf.xlu0 }
 0xcd5   : >> { %v4721_v23 = vpop.eup %4720 }
 0xcd6   : >> { %4483 = vmatprep.subr.msk.bf16.mxu0 %vm1976_vm3, %v3010_v19  ;;  %v3005_v4 = vmul.f32 %v4721_v23, %v4713_v30  ;;  %v3183_v45 = vsel %vm1976_vm3, %v3010_v19, 0 }
 0xcd8   : >> { %v3009_v22 = vpack.c.bf16 %v3005_v4, %v3005_v4  ;;  %v3094_v43 = vpop.trf.xlu1  ;;  %v3169_v54 = vpop.trf.xlu0 }
 0xcd9   : >> { %4425 = vmatprep.mubr.msk.bf16.mxu1 %vm1976_vm3, %v3094_v43 }
 0xcda   : >> { %4482 = vmatprep.subr.msk.bf16.mxu1 %vm1976_vm3, %v3009_v22  ;;  %4420 = vmatmul.mubr.msk.bf16.vlgmr.msra.gmra.mrb[44].mxu0 %vm1976_vm3, %v3021_v3  ;;  %v3109_v5 = vsel %vm1976_vm3, %v3009_v22, 0 }
 0xcdb   : >> { %4424 = vmatpush3.bf16.xpose.msra.mxu1 %v3109_v5  ;;  %4430 = vmatpush3.bf16.xpose.msra.mxu0 %v3183_v45 }
 0xcdc   : >> { %v3095_v47 = vpop.trf.xlu1  ;;  %4431 = vmatprep.mubr.msk.bf16.mxu0 %vm1976_vm3, %v3168_v46  ;;  %4441 = vmatprep.subr.bf16.mxu0 %v4656_v38 }
 0xcdd   : >> { %v4723_v50 = vpop.eup %4722 }
 0xcde   : >> { %v3007_v51 = vmul.f32 %v4723_v50, %v4715_v34 }
 0xce0   : >> { %v3011_v53 = vpack.c.bf16 %v3007_v51, %v3007_v51  ;;  %v3242_v55 = vpop.trf.xlu1 }
 0xce2   : >> { %4426 = vmatmul.mubr.msk.bf16.vlgmr.msra.gmra.mrb[48].mxu1 %vm1976_vm3, %v3095_v47  ;;  %4484 = vmatprep.subr.msk.bf16.mxu1 %vm1976_vm3, %v3011_v53  ;;  %v3257_v57 = vsel %vm1976_vm3, %v3011_v53, 0 }
 0xce3   : >> { %4436 = vmatpush3.bf16.xpose.msra.mxu1 %v3257_v57  ;;  %4437 = vmatprep.mubr.msk.bf16.mxu1 %vm1976_vm3, %v3242_v55 }
 0xce4   : >> { %4432 = vmatmul.mubr.msk.bf16.vlgmr.msra.gmra.mrb[48].mxu0 %vm1976_vm3, %v3169_v54  ;;  %v3243_v58 = vpop.trf.xlu1 }
 0xce5   : >> { %4442 = vmatpush3.bf16.msra.mxu0 %v4656_v38 }
 0xce6   : >> { %4443 = vmatprep.subr.bf16.mxu0 %v4657_v40 }
 0xce9   : >> { %4444 = vmatpush3.bf16.msra.mxu0 %v4657_v40 }
 0xcea   : >> { %4438 = vmatmul.mubr.msk.bf16.vlgmr.msra.gmra.mrb[52].mxu1 %vm1976_vm3, %v3243_v58 }
 0xdad   : >> { %v4421_v59 = vpop.f32.mrb[44].mxu0 }
 0xdae   : >> { %3310 = vst.msk [vmem:[#allocation2 + $0x10] sm:$0xff] %vm1528_vm2, %v4421_v59  ;;  %v3071_v62 = vpop.f32.mrb[45].mxu0 }
 0xdaf   : >> { %3308 = vst.msk [vmem:[#allocation2] sm:$0xff] %vm1528_vm2, %v3071_v62  ;;  %v4422_v14 = vpop.f32.mrb[46].mxu0 }
 0xdb0   : >> { %3311 = vst.msk [vmem:[#allocation2 + $0x18] sm:$0xff] %vm1528_vm2, %v4422_v14  ;;  %v3074_v29 = vpop.f32.mrb[47].mxu0 }
 0xdb1   : >> { %3309 = vst.msk [vmem:[#allocation2 + $0x8] sm:$0xff] %vm1528_vm2, %v3074_v29 }
 0xdb5   : >> { %v4427_v31 = vpop.f32.mrb[48].mxu1 }
 0xdb6   : >> { %3314 = vst.msk [vmem:[#allocation2 + $0x30] sm:$0xff] %vm1528_vm2, %v4427_v31  ;;  %v3145_v33 = vpop.f32.mrb[49].mxu1 }
 0xdb7   : >> { %3312 = vst.msk [vmem:[#allocation2 + $0x20] sm:$0xff] %vm1528_vm2, %v3145_v33  ;;  %v4428_v15 = vpop.f32.mrb[50].mxu1  ;;  %v4433_v36 = vpop.f32.mrb[48].mxu0 }
 0xdb8   : >> { %3315 = vst.msk [vmem:[#allocation2 + $0x38] sm:$0xff] %vm1528_vm2, %v4428_v15  ;;  %v3148_v18 = vpop.f32.mrb[51].mxu1  ;;  %3318 = vst.msk [vmem:[#allocation2 + $0x50] sm:$0xff] %vm1528_vm2, %v4433_v36  ;;  %v3219_v21 = vpop.f32.mrb[49].mxu0  ;;  %v3332_v26 = vld [vmem:[#allocation2 + $0x2] ss:$4 sm:$0xff] }
 0xdb9   : >> { %3313 = vst.msk [vmem:[#allocation2 + $0x28] sm:$0xff] %vm1528_vm2, %v3148_v18  ;;  %3316 = vst.msk [vmem:[#allocation2 + $0x40] sm:$0xff] %vm1528_vm2, %v3219_v21  ;;  %v4434_v52 = vpop.f32.mrb[50].mxu0  ;;  %v3328_v27 = vld [vmem:[#allocation2 + $0x1] ss:$4 sm:$0xff] }
 0xdba   : >> { %3319 = vst.msk [vmem:[#allocation2 + $0x58] sm:$0xff] %vm1528_vm2, %v4434_v52  ;;  %v3222_v44 = vpop.f32.mrb[51].mxu0  ;;  %v3336_v2 = vld [vmem:[#allocation2 + $0x3] ss:$4 sm:$0xff]  ;;  %v3324_v47 = vld [vmem:[#allocation2] ss:$4 sm:$0xff] }
 0xdbb   : >> { %3317 = vst.msk [vmem:[#allocation2 + $0x48] sm:$0xff] %vm1528_vm2, %v3222_v44 }
 0xdbd   : >> { %v4439_v24 = vpop.f32.mrb[52].mxu1 }
 0xdbe   : >> { %3322 = vst.msk [vmem:[#allocation2 + $0x70] sm:$0xff] %vm1528_vm2, %v4439_v24  ;;  %v3293_v25 = vpop.f32.mrb[53].mxu1 }
 0xdbf   : >> { %3320 = vst.msk [vmem:[#allocation2 + $0x60] sm:$0xff] %vm1528_vm2, %v3293_v25  ;;  %v4440_v49 = vpop.f32.mrb[54].mxu1 }
 0xdc0   : >> { %3323 = vst.msk [vmem:[#allocation2 + $0x78] sm:$0xff] %vm1528_vm2, %v4440_v49  ;;  %v3296_v28 = vpop.f32.mrb[55].mxu1  ;;  %v3333_v30 = vld [vmem:[#allocation2 + $0x22] ss:$4 sm:$0xff]  ;;  %v3329_v32 = vld [vmem:[#allocation2 + $0x21] ss:$4 sm:$0xff] }
 0xdc1   : >> { %3321 = vst.msk [vmem:[#allocation2 + $0x68] sm:$0xff] %vm1528_vm2, %v3296_v28  ;;  %v4607_v34 = vpack.i.bf16 %v3333_v30, %v3332_v26  ;;  %v4602_v35 = vpack.i.bf16 %v3329_v32, %v3328_v27  ;;  %v3337_v37 = vld [vmem:[#allocation2 + $0x23] ss:$4 sm:$0xff]  ;;  %v3325_v50 = vld [vmem:[#allocation2 + $0x20] ss:$4 sm:$0xff] }
 0xdc2   : >> { %v4612_v39 = vpack.i.bf16 %v3337_v37, %v3336_v2  ;;  %v3330_v41 = vld [vmem:[#allocation2 + $0x41] ss:$4 sm:$0xff]  ;;  %v3334_v16 = vld [vmem:[#allocation2 + $0x42] ss:$4 sm:$0xff]  ;;  %v3338_v23 = vld [vmem:[#allocation2 + $0x43] ss:$4 sm:$0xff] }
 0xdc3   : >> { %4608 = vrot.lane.b32.xlu1 %v4607_v34, %s4823_s18  ;;  %4603 = vrot.lane.b32.xlu0 %v4602_v35, %s4824_s22  ;;  %v3326_v52 = vld [vmem:[#allocation2 + $0x40] ss:$4 sm:$0xff] }
 0xdc7   : >> { %4613 = vrot.lane.b32.xlu0 %v4612_v39, %s4825_s1 }
 0xdc8   : >> { %v3331_v42 = vld [vmem:[#allocation2 + $0x61] ss:$4 sm:$0xff]  ;;  %v3335_v17 = vld [vmem:[#allocation2 + $0x62] ss:$4 sm:$0xff]  ;;  %v3339_v19 = vld [vmem:[#allocation2 + $0x63] ss:$4 sm:$0xff] }
 0xdc9   : >> { %v4617_v20 = vpack.i.bf16 %v3331_v42, %v3330_v41  ;;  %v4622_v48 = vpack.i.bf16 %v3335_v17, %v3334_v16  ;;  %v4627_v4 = vpack.i.bf16 %v3339_v19, %v3338_v23  ;;  %v3327_v44 = vld [vmem:[#allocation2 + $0x60] ss:$4 sm:$0xff] }
 0xdcb   : >> { %4618 = vrot.lane.b32.xlu1 %v4617_v20, %s4824_s22 }
 0xdcf   : >> { %4623 = vrot.lane.b32.xlu1 %v4622_v48, %s4823_s18  ;;  %s5524_s18 = sld [smem:[#allocation10_spill]] }
 0xdd3   : >> { %4628 = vrot.lane.b32.xlu1 %v4627_v4, %s4825_s1  ;;  %s5525_s1 = sld [smem:[#allocation18_spill]] }
 0xdd5   : >> { %s3408_s22 = scalar_lea.vmem %s5524_s18, %s4786_s26  ;;  %s3702_s18 = scalar_lea.vmem %s4994_s24, %s4786_s26 }
 0xdd6   : >> { %v4096_v37 = vld [vmem:[%s3408_s22] ss:$0 sm:$0xff] }
 0xdd9   : >> { %s3566_s0 = scalar_lea.vmem %s5525_s1, %s5062_s28  ;;  %s3487_s28 = scalar_lea.vmem %s5526_s15, %s4786_s26 }
 0xdda   : >> { %s1060_s26 = sadd.s32 1, %s4786_s26  }
 0xddb   : >> { %p1057_p5 = scmp.ge.s32.totalorder %s1060_s26, 2  }
 0xe35   : >> { %v4609_v3 = vpop.permute.xlu1 %4608  ;;  %v4604_v22 = vpop.permute.xlu0 %4603 }
 0xe36   : >> { %v4606_v43 = vunpack.i.h.bf16 %v4604_v22  ;;  %v4605_v5 = vunpack.i.l.bf16 %v4604_v22  ;;  %v4611_v45 = vunpack.i.h.bf16 %v4609_v3  ;;  %v4610_v46 = vunpack.i.l.bf16 %v4609_v3 }
 0xe38   : >> { %v3388_v51 = vsel %vm1528_vm2, %v3324_v47, %v4605_v5  ;;  %v3389_v53 = vsel %vm1528_vm2, %v3325_v50, %v4606_v43 }
 0xe39   : >> { %v4614_v55 = vpop.permute.xlu0 %4613  ;;  %v3392_v58 = vsel %vm1976_vm3, %v3388_v51, %v4610_v46  ;;  %v3393_v59 = vsel %vm1976_vm3, %v3389_v53, %v4611_v45 }
 0xe3a   : >> { %v4616_v54 = vunpack.i.h.bf16 %v4614_v55  ;;  %v4615_v57 = vunpack.i.l.bf16 %v4614_v55 }
 0xe3c   : >> { %v3396_v62 = vsel %vm1981_vm4, %v3392_v58, %v4615_v57  ;;  %v3397_v14 = vsel %vm1981_vm4, %v3393_v59, %v4616_v54 }
 0xe3d   : >> { %v3400_v29 = vpack.c.bf16 %v3397_v14, %v3396_v62  ;;  %v4619_v31 = vpop.permute.xlu1 %4618 }
 0xe3e   : >> { %v4621_v15 = vunpack.i.h.bf16 %v4619_v31  ;;  %v4620_v36 = vunpack.i.l.bf16 %v4619_v31 }
 0xe3f   : >> { %4445 = vmatprep.mubr.msk.bf16.mxu0 %vm1094_vm0, %v3400_v29 }
 0xe40   : >> { %v3390_v25 = vsel %vm1528_vm2, %v3326_v52, %v4620_v36  ;;  %v3391_v49 = vsel %vm1528_vm2, %v3327_v44, %v4621_v15  ;;  %v4659_v15 = vld [vmem:[%s3566_s0 + $0x8] sm:$0xff]  }
 0xe41   : >> { %v4624_v33 = vpop.permute.xlu1 %4623 }
 0xe42   : >> { %v4626_v18 = vunpack.i.h.bf16 %v4624_v33  ;;  %v4625_v21 = vunpack.i.l.bf16 %v4624_v33  ;;  %v4658_v33 = vld [vmem:[%s3566_s0] sm:$0xff]  }
 0xe43   : >> { %4449 = vmatprep.subr.bf16.mxu1 %v4658_v33 }
 0xe44   : >> { %v3394_v28 = vsel %vm1976_vm3, %v3390_v25, %v4625_v21  ;;  %v3395_v30 = vsel %vm1976_vm3, %v3391_v49, %v4626_v18  ;;  %4450 = vmatpush3.bf16.msra.mxu1 %v4658_v33 }
 0xe45   : >> { %v4629_v24 = vpop.permute.xlu1 %4628  ;;  %4451 = vmatprep.subr.bf16.mxu1 %v4659_v15 }
 0xe46   : >> { %v4631_v26 = vunpack.i.h.bf16 %v4629_v24  ;;  %v4630_v27 = vunpack.i.l.bf16 %v4629_v24 }
 0xe48   : >> { %v3398_v32 = vsel %vm1981_vm4, %v3394_v28, %v4630_v27  ;;  %v3399_v34 = vsel %vm1981_vm4, %v3395_v30, %v4631_v26  ;;  %4452 = vmatpush3.bf16.msra.mxu1 %v4659_v15 }
 0xe49   : >> { %v3401_v35 = vpack.c.bf16 %v3399_v34, %v3398_v32  ;;  %v4101_v34 = vld [vmem:[%s3487_s28] ss:$0 sm:$0xff] }
 0xe4b   : >> { %4446 = vmatmul.mubr.msk.bf16.vlgmr.msra.gmra.mrb[52].mxu0 %vm1094_vm0, %v3401_v35 }
 0xf1e   : >> { %v4447_v2 = vpop.f32.mrb[52].mxu0 }
 0xf1f   : >> { %v3468_v38 = vpop.f32.mrb[53].mxu0  ;;  %v3477_v39 = vadd.f32 %v4447_v2, %v4096_v37 }
 0xf20   : >> { %v3469_v40 = vadd.f32 %v4096_v37, %v3468_v38  ;;  %v4448_v41 = vpop.f32.mrb[54].mxu0 }
 0xf21   : >> { %v3471_v42 = vpop.f32.mrb[55].mxu0  ;;  %v5430_v16 = vadd.f32 %v3477_v39, %v5238_v60  ;;  %v3480_v48 = vadd.f32 %v4448_v41, %v4096_v37 }
 0xf22   : >> { %v5427_v20 = vadd.f32 %v3469_v40, %v5235_v56  ;;  %v3472_v17 = vadd.f32 %v4096_v37, %v3471_v42  ;;  %v4102_v40 = vld [vmem:[%s3489_s2] ss:$0 sm:$0xff] }
 0xf23   : >> { %v5440_v3 = vadd.f32 %v3480_v48, %v5246_v63  ;;  %v3497_v56 = vsel %vm1094_vm0, %v5430_v16, 0.0 }
 0xf24   : >> { %v5433_v19 = vadd.f32 %v3472_v17, %v5241_v61  ;;  %v3491_v23 = vsel %vm1094_vm0, %v5427_v20, 0.0 }
 0xf25   : >> { %3492 = vadd.xlane.f32.xlu0 %v3491_v23  ;;  %v3500_v60 = vsel %vm1094_vm0, %v5440_v3, 0.0 }
 0xf26   : >> { %v3494_v4 = vsel %vm1094_vm0, %v5433_v19, 0.0 }
 0xf27   : >> { %3495 = vadd.xlane.f32.xlu1 %v3494_v4 }
 0xf29   : >> { %3498 = vadd.xlane.f32.xlu0 %v3497_v56 }
 0xf2d   : >> { %3501 = vadd.xlane.f32.xlu0 %v3500_v60 }
 0xfb2   : >> { %v3493_v61 = vpop.xlane.xlu0 %3492 }
 0xfb3   : >> { %v3503_v22 = vmul.f32 0.03125, %v3493_v61 }
 0xfb4   : >> { %v3496_v43 = vpop.xlane.xlu1 %3495 }
 0xfb5   : >> { %v3507_v5 = vsub.f32 %v5427_v20, %v3503_v22  ;;  %v3504_v45 = vmul.f32 0.03125, %v3496_v43 }
 0xfb6   : >> { %v3499_v46 = vpop.xlane.xlu0 %3498 }
 0xfb7   : >> { %v3508_v47 = vsub.f32 %v5433_v19, %v3504_v45  ;;  %v3505_v50 = vmul.f32 0.03125, %v3499_v46  ;;  %v3511_v63 = vmul.f32 %v3507_v5, %v3507_v5  ;;  %v4660_v45 = vld [vmem:[%s3685_s11] sm:$0xff]   ;;  %v4661_v46 = vld [vmem:[%s3685_s11 + $0x8] sm:$0xff]  }
 0xfb8   : >> { %4457 = vmatprep.subr.bf16.mxu0 %v4660_v45 }
 0xfb9   : >> { %v3509_v51 = vsub.f32 %v5430_v16, %v3505_v50  ;;  %v3515_v53 = vsel %vm1094_vm0, %v3511_v63, 0.0  ;;  %v3512_v55 = vmul.f32 %v3508_v47, %v3508_v47  ;;  %4458 = vmatpush3.bf16.msra.mxu0 %v4660_v45  ;;  %v4663_v50 = vld [vmem:[%s3685_s11 + $0x18] sm:$0xff]   ;;  %v4664_v63 = vld [vmem:[%s3685_s11 + $0x20] sm:$0xff]  }
 0xfba   : >> { %3516 = vadd.xlane.f32.xlu0 %v3515_v53  ;;  %v3502_v54 = vpop.xlane.xlu0 %3501  ;;  %4459 = vmatprep.subr.bf16.mxu0 %v4661_v46  ;;  %v4666_v53 = vld [vmem:[%s3685_s11 + $0x30] sm:$0xff]  }
 0xfbb   : >> { %v3506_v57 = vmul.f32 0.03125, %v3502_v54  ;;  %v3518_v58 = vsel %vm1094_vm0, %v3512_v55, 0.0  ;;  %v3513_v59 = vmul.f32 %v3509_v51, %v3509_v51  ;;  %v4667_v55 = vld [vmem:[%s3685_s11 + $0x38] sm:$0xff]   ;;  %v4104_v54 = vld [vmem:[%s3571_s16] ss:$0 sm:$0xff] }
 0xfbc   : >> { %3519 = vadd.xlane.f32.xlu1 %v3518_v58 }
 0xfbd   : >> { %v3510_v62 = vsub.f32 %v5440_v3, %v3506_v57  ;;  %v3521_v14 = vsel %vm1094_vm0, %v3513_v59, 0.0  ;;  %4460 = vmatpush3.bf16.msra.mxu0 %v4661_v46 }
 0xfbe   : >> { %3522 = vadd.xlane.f32.xlu0 %v3521_v14 }
 0xfbf   : >> { %v3514_v29 = vmul.f32 %v3510_v62, %v3510_v62 }
 0xfc1   : >> { %v3524_v31 = vsel %vm1094_vm0, %v3514_v29, 0.0 }
 0xfc2   : >> { %3525 = vadd.xlane.f32.xlu1 %v3524_v31 }
0x1047   : >> { %v3517_v36 = vpop.xlane.xlu0 %3516 }
0x1048   : >> { %v3527_v18 = vmul.f32 0.03125, %v3517_v36 }
0x1049   : >> { %v3520_v21 = vpop.xlane.xlu1 %3519 }
0x104a   : >> { %v3531_v52 = vadd.f32 1e-05, %v3527_v18  ;;  %v3528_v44 = vmul.f32 0.03125, %v3520_v21 }
0x104b   : >> { %v3523_v24 = vpop.xlane.xlu0 %3522 }
0x104c   : >> { %4724 = vrsqrt.f32 %v3531_v52  ;;  %v3532_v25 = vadd.f32 1e-05, %v3528_v44  ;;  %v3529_v49 = vmul.f32 0.03125, %v3523_v24 }
0x104e   : >> { %4726 = vrsqrt.f32 %v3532_v25  ;;  %v3533_v26 = vadd.f32 1e-05, %v3529_v49 }
0x104f   : >> { %v3526_v27 = vpop.xlane.xlu1 %3525 }
0x1050   : >> { %4728 = vrsqrt.f32 %v3533_v26  ;;  %v3530_v28 = vmul.f32 0.03125, %v3526_v27 }
0x1052   : >> { %v3534_v30 = vadd.f32 1e-05, %v3530_v28 }
0x1054   : >> { %4730 = vrsqrt.f32 %v3534_v30 }
0x1056   : >> { %v4725_v32 = vpop.eup %4724 }
0x1057   : >> { %v3539_v35 = vmul.f32 %v4725_v32, %v3507_v5 }
0x1058   : >> { %v4727_v37 = vpop.eup %4726 }
0x1059   : >> { %v3540_v2 = vmul.f32 %v4727_v37, %v3508_v47  ;;  %v3549_v38 = vmul.f32 %v4101_v34, %v3539_v35  ;;  %v4662_v47 = vld [vmem:[%s3685_s11 + $0x10] sm:$0xff]  }
0x105a   : >> { %v4729_v39 = vpop.eup %4728  ;;  %4461 = vmatprep.subr.bf16.mxu0 %v4662_v47 }
0x105b   : >> { %v3541_v41 = vmul.f32 %v4729_v39, %v3509_v51  ;;  %v3550_v42 = vmul.f32 %v4101_v34, %v3540_v2  ;;  %v3559_v17 = vadd.f32 %v4102_v40, %v3549_v38  ;;  %4462 = vmatpush3.bf16.msra.mxu0 %v4662_v47  ;;  %v4665_v51 = vld [vmem:[%s3685_s11 + $0x28] sm:$0xff]  }
0x105c   : >> { %4463 = vmatprep.subr.bf16.mxu0 %v4663_v50 }
0x105d   : >> { %v3560_v48 = vadd.f32 %v4102_v40, %v3550_v42  ;;  %v3551_v4 = vmul.f32 %v4101_v34, %v3541_v41 }
0x105e   : >> { %v4731_v23 = vpop.eup %4730 }
0x105f   : >> { %v3542_v56 = vmul.f32 %v4731_v23, %v3510_v62  ;;  %v3563_v60 = vpack.c.bf16 %v3560_v48, %v3559_v17  ;;  %v3561_v22 = vadd.f32 %v4102_v40, %v3551_v4  ;;  %4464 = vmatpush3.bf16.msra.mxu0 %v4663_v50 }
0x1060   : >> { %4465 = vmatprep.subr.bf16.mxu0 %v4664_v63 }
0x1061   : >> { %v3552_v61 = vmul.f32 %v4101_v34, %v3542_v56  ;;  %4453 = vmatprep.mubr.msk.bf16.mxu1 %vm1094_vm0, %v3563_v60 }
0x1063   : >> { %v3562_v43 = vadd.f32 %v4102_v40, %v3552_v61  ;;  %4466 = vmatpush3.bf16.msra.mxu0 %v4664_v63 }
0x1064   : >> { %4467 = vmatprep.subr.bf16.mxu0 %v4665_v51 }
0x1065   : >> { %v3564_v5 = vpack.c.bf16 %v3562_v43, %v3561_v22 }
0x1067   : >> { %4454 = vmatmul.mubr.msk.bf16.vlgmr.msra.gmra.mrb[56].mxu1 %vm1094_vm0, %v3564_v5  ;;  %4468 = vmatpush3.bf16.msra.mxu0 %v4665_v51  ;;  %v4110_v51 = vld [vmem:[%s3702_s18] ss:$0 sm:$0xff] }
0x1068   : >> { %4469 = vmatprep.subr.bf16.mxu0 %v4666_v53 }
0x106b   : >> { %4470 = vmatpush3.bf16.msra.mxu0 %v4666_v53 }
0x106c   : >> { %4471 = vmatprep.subr.bf16.mxu0 %v4667_v55 }
0x106f   : >> { %4472 = vmatpush3.bf16.msra.mxu0 %v4667_v55 }
0x113a   : >> { %v4455_v57 = vpop.f32.mrb[56].mxu1 }
0x113b   : >> { %v3640_v58 = vadd.f32 %v4455_v57, %v4104_v54  ;;  %v3631_v59 = vpop.f32.mrb[57].mxu1 }
0x113c   : >> { %v3632_v62 = vadd.f32 %v4104_v54, %v3631_v59  ;;  %v4456_v14 = vpop.f32.mrb[58].mxu1 }
0x113d   : >> { %v3652_v29 = vmul.f32 0.044715, %v3640_v58  ;;  %v3643_v31 = vadd.f32 %v4456_v14, %v4104_v54  ;;  %v3634_v33 = vpop.f32.mrb[59].mxu1  ;;  %v3648_v4 = vmul.f32 0.5, %v3640_v58 }
0x113e   : >> { %v3650_v15 = vmul.f32 0.044715, %v3632_v62  ;;  %v3635_v36 = vadd.f32 %v4104_v54, %v3634_v33  ;;  %v3646_v61 = vmul.f32 0.5, %v3632_v62 }
0x113f   : >> { %v3656_v18 = vmul.f32 %v3652_v29, %v3640_v58  ;;  %v3653_v21 = vmul.f32 0.044715, %v3643_v31  ;;  %v3649_v56 = vmul.f32 0.5, %v3643_v31 }
0x1140   : >> { %v3654_v52 = vmul.f32 %v3650_v15, %v3632_v62  ;;  %v3651_v44 = vmul.f32 0.044715, %v3635_v36  ;;  %v3647_v22 = vmul.f32 0.5, %v3635_v36 }
0x1141   : >> { %v3660_v24 = vmul.f32 %v3656_v18, %v3640_v58  ;;  %v3657_v25 = vmul.f32 %v3653_v21, %v3643_v31 }
0x1142   : >> { %v3658_v49 = vmul.f32 %v3654_v52, %v3632_v62  ;;  %v3655_v26 = vmul.f32 %v3651_v44, %v3635_v36 }
0x1143   : >> { %v3664_v27 = vadd.f32 %v3660_v24, %v3640_v58  ;;  %v3661_v28 = vmul.f32 %v3657_v25, %v3643_v31 }
0x1144   : >> { %v3659_v30 = vmul.f32 %v3655_v26, %v3635_v36  ;;  %v3662_v32 = vadd.f32 %v3658_v49, %v3632_v62 }
0x1145   : >> { %v3668_v34 = vmul.f32 0.7978846, %v3664_v27  ;;  %v3665_v35 = vadd.f32 %v3661_v28, %v3643_v31 }
0x1146   : >> { %v3663_v37 = vadd.f32 %v3659_v30, %v3635_v36  ;;  %v3666_v2 = vmul.f32 0.7978846, %v3662_v32 }
0x1147   : >> { %4732 = vtanh.f32 %v3668_v34  ;;  %v3669_v38 = vmul.f32 0.7978846, %v3665_v35 }
0x1148   : >> { %v3667_v39 = vmul.f32 0.7978846, %v3663_v37  ;;  %4734 = vtanh.f32 %v3666_v2 }
0x1149   : >> { %4736 = vtanh.f32 %v3669_v38 }
0x114a   : >> { %4738 = vtanh.f32 %v3667_v39 }
0x1151   : >> { %v4733_v40 = vpop.eup %4732 }
0x1152   : >> { %v4735_v41 = vpop.eup %4734  ;;  %v3676_v42 = vadd.f32 1.0, %v4733_v40 }
0x1153   : >> { %v4737_v17 = vpop.eup %4736  ;;  %v3674_v48 = vadd.f32 1.0, %v4735_v41 }
0x1154   : >> { %v4739_v23 = vpop.eup %4738  ;;  %v3677_v60 = vadd.f32 1.0, %v4737_v17  ;;  %v3680_v5 = vmul.f32 %v3676_v42, %v3648_v4 }
0x1155   : >> { %v3675_v43 = vadd.f32 1.0, %v4739_v23  ;;  %v3678_v46 = vmul.f32 %v3674_v48, %v3646_v61 }
0x1156   : >> { %v3681_v45 = vmul.f32 %v3677_v60, %v3649_v56 }
0x1157   : >> { %v3679_v47 = vmul.f32 %v3675_v43, %v3647_v22 }
0x1158   : >> { %v3683_v50 = vpack.c.bf16 %v3681_v45, %v3680_v5 }
0x1159   : >> { %v3682_v63 = vpack.c.bf16 %v3679_v47, %v3678_v46 }
0x115b   : >> { %4473 = vmatprep.mubr.bf16.mxu0 %v3682_v63 }
0x115c   : >> { %4474 = vmatmul.mubr.bf16.vlgmr.msra.gmra.mrb[56].mxu0 %v3683_v50 }
0x122f   : >> { %v4475_v53 = vpop.f32.mrb[56].mxu0 }
0x1230   : >> { %v3801_v55 = vadd.f32 %v4475_v53, %v4110_v51  ;;  %v3792_v54 = vpop.f32.mrb[57].mxu0 }
0x1231   : >> { %v3793_v57 = vadd.f32 %v4110_v51, %v3792_v54  ;;  %v4476_v58 = vpop.f32.mrb[58].mxu0  ;;  %1059 = sbr.rel (!%p1057_p5) target bundleno = 71 (0x47), region = 270 }
0x1232   : >> { %v3809_v59 = vadd.f32 %v3801_v55, %v5430_v16   ;;  %v3804_v62 = vadd.f32 %v4476_v58, %v4110_v51  ;;  %v3795_v14 = vpop.f32.mrb[59].mxu0 }
0x1233   : >> { %v3807_v29 = vadd.f32 %v3793_v57, %v5427_v20   ;;  %v3796_v31 = vadd.f32 %v4110_v51, %v3795_v14 }
0x1234   : >> { %v3810_v33 = vadd.f32 %v3804_v62, %v5440_v3   ;;  %v5529_v4 = vmov %v3809_v59  ;;  %3814 = vst.msk [vmem:[%s5018_s23 + $0x10] sm:$0xff] (%p1057_p5), %vm1094_vm0, %v3809_v59 }
0x1235   : >> { %v3808_v15 = vadd.f32 %v3796_v31, %v5433_v19   ;;  %v5531_v2 = vmov %v3807_v29  ;;  %3812 = vst.msk [vmem:[%s5018_s23] sm:$0xff] (%p1057_p5), %vm1094_vm0, %v3807_v29 }
0x1236   : >> { %v5528_v5 = vmov %v3810_v33  ;;  %3815 = vst.msk [vmem:[%s5018_s23 + $0x18] sm:$0xff] (%p1057_p5), %vm1094_vm0, %v3810_v33 }
0x1237   : >> { %v5530_v3 = vmov %v3808_v15  ;;  %3813 = vst.msk [vmem:[%s5018_s23 + $0x8] sm:$0xff] (%p1057_p5), %vm1094_vm0, %v3808_v15 }
0x1238 PF: > { %s77_s7 = sadd.s32 1, %s4766_s7  }
0x1239   : > { %p74_p6 = scmp.ge.s32.totalorder %s77_s7, 4  }
0x123b   :  { %76 = sbr.rel (!%p74_p6) target bundleno = 52 (0x34), region = 281 }

</bundles_post_ra>
